<compile_context>
chip_gen: v7x
topology: tpu7x:2x2x1
jax: 0.10.0
libtpu: 0.0.40
codegen_flags: <defaults>
</compile_context>

<pallas_src>
import functools

import numpy as np
import jax
import jax.numpy as jnp
from jax import lax
from jax.experimental import pallas as pl
from jax.experimental.pallas import tpu as pltpu

JOINT_TRANS = True
VISUAL_GRAPH_PASSING_TIME = 2
_EPS = 1e-6
_VMEM_LIMIT = 48 * 1024 * 1024    # safe on v5e/v6e (128 MiB) and v7x (64 MiB / TC)
_VMEM_BUDGET = 40 * 1024 * 1024   # tile-selection budget (double-buffer aware)


def _round_up(x, m):
    return ((x + m - 1) // m) * m


def _edge_tile(ep, d):
    """Largest edge row tile (1024..128) whose working set fits the VMEM budget."""
    resident = 2 * ((3 * d * d + 2 * d * d + 2 * d * d) * 4 + 4 * d * 4)   # weights, x2 buffers
    for te in (1024, 512, 256, 128):
        if ep % te:
            continue
        streams = 2 * (te * 3 * d * 4 + te * 4 + 2 * te * 2 * d * 2)
        if resident + streams <= _VMEM_BUDGET:
            return te
    return 128


def _node_tile(n_pad, ep, d):
    """Budget-driven node row tile so a tiling that fits v6e doesn't blow v7x VMEM."""
    resident = 2 * (2 * ep * 2 * d * 2 + 2 * ep * 4 + 2 * d * d * 4 + d * 4)
    scratch = 2 * ep * 2 * d * 4          # in-kernel f32 scaled copies of cat_s / cat_o
    for tn in (512, 256, 128):
        if n_pad % tn:
            continue
        streams = 2 * (2 * tn * d * 4 + tn * 4 + 2 * tn * ep * 2)
        if resident + scratch + streams <= _VMEM_BUDGET:
            return tn
    return 128


# --------------------------------------------------------------------------
# Kernel 1: per-edge linear layers + attention logits (+ edge-context features)
# --------------------------------------------------------------------------
def _edge_kernel(cat_ref, wrel_ref, br_ref, wsx_ref, wox_ref, wrt_ref,
                 bs_ref, bo_ref, logit_ref, cats_ref, cato_ref, *, d, scale):
    cat = cat_ref[...]                                   # (te, 3D) f32 = [sub | obj | rel]
    sub = cat[:, :d]
    obj = cat[:, d:2 * d]
    # rel_update_embedding(cat(sub, obj, rel)): one K=3D matmul (fills 256-wide MXUs).
    relj = jnp.dot(cat, wrel_ref[...], preferred_element_type=jnp.float32) + br_ref[...]
    # visual_joint_trans_{sbj,obj}: shared relj contribution as a single (D, 2D) matmul.
    trel = jnp.dot(relj, wrt_ref[...], preferred_element_type=jnp.float32)     # (te, 2D)
    t_sbj = (jnp.dot(sub, wsx_ref[...], preferred_element_type=jnp.float32)
             + trel[:, :d] + bs_ref[...])
    t_obj = (jnp.dot(obj, wox_ref[...], preferred_element_type=jnp.float32)
             + trel[:, d:] + bo_ref[...])
    prod = t_sbj * t_obj
    # Lane-dense (1, te) logits via a tiny NT matmul against a ones row (avoids a
    # lane-width-1 masked store / cross-lane relayout of the row sums).
    ones_row = jnp.ones((1, d), jnp.float32)
    logit_ref[...] = scale * lax.dot_general(
        ones_row, prod, (((1,), (1,)), ((), ())), preferred_element_type=jnp.float32)
    # Edge-context features consumed by the node kernel; bf16 writeback halves HBM.
    cats_ref[...] = jnp.concatenate([obj, relj], axis=1).astype(jnp.bfloat16)  # (te, 2D)
    cato_ref[...] = jnp.concatenate([sub, relj], axis=1).astype(jnp.bfloat16)


def _edge_pass(cat_in, wrel, br, wsx, wox, wrt, bs, bo, scale):
    Ep, three_d = cat_in.shape
    D = three_d // 3
    te = _edge_tile(Ep, D)
    row3 = pl.BlockSpec((te, 3 * D), lambda i: (i, 0))
    const = lambda shape: pl.BlockSpec(shape, lambda i: (0, 0))
    # TODO(synk): the constant-index_map weight operands could be single-buffered
    # (pipeline_mode=pl.Buffered(1)) on VMEM-tight v7x.
    return pl.pallas_call(
        functools.partial(_edge_kernel, d=D, scale=scale),
        grid=(Ep // te,),
        in_specs=[row3,
                  const((3 * D, D)), const((1, D)),
                  const((D, D)), const((D, D)),
                  const((D, 2 * D)), const((1, D)), const((1, D))],
        out_specs=(pl.BlockSpec((1, te), lambda i: (0, i)),
                   pl.BlockSpec((te, 2 * D), lambda i: (i, 0)),
                   pl.BlockSpec((te, 2 * D), lambda i: (i, 0))),
        out_shape=(jax.ShapeDtypeStruct((1, Ep), jnp.float32),
                   jax.ShapeDtypeStruct((Ep, 2 * D), jnp.bfloat16),
                   jax.ShapeDtypeStruct((Ep, 2 * D), jnp.bfloat16)),
        compiler_params=pltpu.CompilerParams(
            dimension_semantics=("parallel",),
            vmem_limit_bytes=_VMEM_LIMIT),
    )(cat_in, wrel, br, wsx, wox, wrt, bs, bo)


# --------------------------------------------------------------------------
# Kernel 2: per-edge scatter-matmul context aggregation + visual_ctx_embedding
# + involved-row residual update.  No dense (N,N) operands anywhere.
# --------------------------------------------------------------------------
def _node_kernel(vj_ref, inv_ref, ohs_ref, oho_ref, cats_ref, cato_ref,
                 ws_ref, wo_ref, wc_ref, bc_ref, out_ref):
    # Per-edge softmax weights are folded in here (no scaled (E,2D) HBM round trip);
    # padded edges carry weight 0 so they contribute nothing.
    feat_s = cats_ref[...].astype(jnp.float32) * ws_ref[...]     # (Ep, 2D)
    feat_o = cato_ref[...].astype(jnp.float32) * wo_ref[...]
    ctx = (jnp.dot(ohs_ref[...].astype(jnp.float32), feat_s,
                   preferred_element_type=jnp.float32)
           + jnp.dot(oho_ref[...].astype(jnp.float32), feat_o,
                     preferred_element_type=jnp.float32))        # (tn, 2D)
    upd = jnp.dot(ctx, wc_ref[...], preferred_element_type=jnp.float32) + bc_ref[...]
    out_ref[...] = vj_ref[...] + inv_ref[...] * upd


def _node_pass(vj, inv, ohs, oho, cat_s, cat_o, w_s, w_o, wc, bc):
    N_pad, D = vj.shape
    Ep = cat_s.shape[0]
    tn = _node_tile(N_pad, Ep, D)
    rownd = pl.BlockSpec((tn, D), lambda i: (i, 0))
    rowne = pl.BlockSpec((tn, Ep), lambda i: (i, 0))
    const = lambda shape: pl.BlockSpec(shape, lambda i: (0, 0))
    return pl.pallas_call(
        _node_kernel,
        grid=(N_pad // tn,),
        in_specs=[rownd, pl.BlockSpec((tn, 1), lambda i: (i, 0)),
                  rowne, rowne,
                  const((Ep, 2 * D)), const((Ep, 2 * D)),
                  const((Ep, 1)), const((Ep, 1)),
                  const((2 * D, D)), const((1, D))],
        out_specs=rownd,
        out_shape=jax.ShapeDtypeStruct((N_pad, D), jnp.float32),
        compiler_params=pltpu.CompilerParams(
            dimension_semantics=("parallel",),
            vmem_limit_bytes=_VMEM_LIMIT),
    )(vj, inv, ohs, oho, cat_s, cat_o, w_s, w_o, wc, bc)


# --------------------------------------------------------------------------
# Parameters (deterministic, synthetic)
# --------------------------------------------------------------------------
def init_params(key, d):
    ks = jax.random.split(key, 4)

    def lin(k, out_d, in_d):
        kw, kb = jax.random.split(k)
        w = 0.02 * jax.random.normal(kw, (out_d, in_d), jnp.float32)
        b = 0.02 * jax.random.normal(kb, (out_d,), jnp.float32)
        return w, b

    w_rel, b_rel = lin(ks[0], d, 3 * d)
    w_s, b_s = lin(ks[1], d, 2 * d)
    w_o, b_o = lin(ks[2], d, 2 * d)
    ctx_in = 2 * d if JOINT_TRANS else d
    w_ctx, b_ctx = lin(ks[3], d, ctx_in)
    return dict(w_rel=w_rel, b_rel=b_rel, w_s=w_s, b_s=b_s,
                w_o=w_o, b_o=b_o, w_ctx=w_ctx, b_ctx=b_ctx)


# --------------------------------------------------------------------------
# Device-side forward: one jitted program covering both passing iterations.
# --------------------------------------------------------------------------
@jax.jit
def _device_forward(params, visual_feat, rel_visual_feat, sbj_pad, obj_pad,
                    edge_valid, inv_mask):
    N, D = visual_feat.shape
    E = rel_visual_feat.shape[0]
    Ep = sbj_pad.shape[0]
    N_pad = _round_up(N, 128)
    f32 = jnp.float32
    scale = 1.0 / float(np.sqrt(D))

    # Pre-split torch-style Linear weights (out, in) into x @ W pieces (all f32;
    # bf16 MXU operands are unsupported on this execution path).
    wrel = params["w_rel"].T.astype(f32)                   # (3D, D)
    br = params["b_rel"][None, :].astype(f32)
    Ws = params["w_s"]
    wsx, wsr = Ws[:, :D].T.astype(f32), Ws[:, D:].T.astype(f32)
    bs = params["b_s"][None, :].astype(f32)
    Wo = params["w_o"]
    wox, wor = Wo[:, :D].T.astype(f32), Wo[:, D:].T.astype(f32)
    bo = params["b_o"][None, :].astype(f32)
    wrt = jnp.concatenate([wsr, wor], axis=1)              # (D, 2D): [wsr | wor]
    wc = params["w_ctx"].T.astype(f32)                     # (2D, D)
    bc = params["b_ctx"][None, :].astype(f32)

    # Pad to lane/sublane friendly extents (no single-mega-block fallback).
    vj = jnp.pad(visual_feat.astype(f32), ((0, N_pad - N), (0, 0)))
    rel_pad = jnp.pad(rel_visual_feat.astype(f32), ((0, Ep - E), (0, 0)))
    inv_pad = jnp.pad(inv_mask, ((0, N_pad - N), (0, 0)))

    # Iteration-invariant one-hot scatter matrices (bf16 storage, exact for 0/1).
    node_ids = jnp.arange(N_pad, dtype=jnp.int32)[:, None]
    ohs = (node_ids == sbj_pad[None, :]).astype(jnp.bfloat16)   # (N_pad, Ep)
    oho = (node_ids == obj_pad[None, :]).astype(jnp.bfloat16)

    for _ in range(VISUAL_GRAPH_PASSING_TIME):
        # TODO(synk): these gathers could move into the edge kernel via
        # PrefetchScalarGridSpec scalar-prefetched indices; kept as XLA glue here.
        sub_f = jnp.take(vj, sbj_pad, axis=0)
        obj_f = jnp.take(vj, obj_pad, axis=0)
        cat_in = jnp.concatenate([sub_f, obj_f, rel_pad], axis=1)     # (Ep, 3D)

        logit_row, cat_s, cat_o = _edge_pass(cat_in, wrel, br, wsx, wox,
                                             wrt, bs, bo, scale)
        logits = logit_row[0]                                          # (Ep,)

        # O(E) segment stats replacing the dense (N,N) masked softmax.  The max is
        # clamped at 0 to preserve the implicit-zero masking convention of
        # numerical_stability_masked_softmax (off-edge entries contribute exp(0)*0).
        lg = jnp.where(edge_valid > 0, logits, -jnp.inf)
        rmax = jnp.maximum(jax.ops.segment_max(lg, sbj_pad, num_segments=N_pad), 0.0)
        es = jnp.exp(logits - rmax[sbj_pad]) * edge_valid
        rsum = jax.ops.segment_sum(es, sbj_pad, num_segments=N_pad) + _EPS
        w_edge_s = (es / rsum[sbj_pad])[:, None]                       # (Ep, 1)
        cmax = jnp.maximum(jax.ops.segment_max(lg, obj_pad, num_segments=N_pad), 0.0)
        eo = jnp.exp(logits - cmax[obj_pad]) * edge_valid
        csum = jax.ops.segment_sum(eo, obj_pad, num_segments=N_pad) + _EPS
        w_edge_o = (eo / csum[obj_pad])[:, None]

        vj = _node_pass(vj, inv_pad, ohs, oho, cat_s, cat_o,
                        w_edge_s, w_edge_o, wc, bc)
    return rel_visual_feat, vj[:N]


# --------------------------------------------------------------------------
# Forward pass (host bookkeeping + jitted device program)
# --------------------------------------------------------------------------
def structure_graph_forward(params, visual_feat, rel_visual_feat, conn_map,
                            topN_boxes_scores):
    num_phrases, topN = topN_boxes_scores.shape
    N = num_phrases * topN
    conn_np = np.asarray(conn_map)
    sbj_ind, obj_ind = np.where(conn_np >= 0)
    E = int(sbj_ind.shape[0])
    if E == 0:
        # No edges: no phrase is "involved" -> visual_joint passes through unchanged.
        return rel_visual_feat, visual_feat

    # involved / non-involved phrase bookkeeping (host side, mirrors the
    # .cpu().numpy() round trip in the PyTorch forward).
    conn_involved = np.unique(np.concatenate((sbj_ind // topN, obj_ind // topN)))
    inv_mask = np.zeros((N, 1), np.float32)
    for pid in range(num_phrases):
        if pid in conn_involved:
            inv_mask[pid * topN:(pid + 1) * topN, 0] = 1.0

    Ep = _round_up(E, 128)
    sbj_pad = np.zeros((Ep,), np.int32)
    obj_pad = np.zeros((Ep,), np.int32)
    edge_valid = np.zeros((Ep,), np.float32)
    sbj_pad[:E] = sbj_ind
    obj_pad[:E] = obj_ind
    edge_valid[:E] = 1.0

    return _device_forward(params, visual_feat, rel_visual_feat,
                           jnp.asarray(sbj_pad), jnp.asarray(obj_pad),
                           jnp.asarray(edge_valid), jnp.asarray(inv_mask))


# --------------------------------------------------------------------------
# Pure-JAX dense reference (literal translation of the PyTorch forward, f32)
# --------------------------------------------------------------------------
def _masked_softmax_ref(vec, mask, axis):
    mv = vec * mask
    mx = jnp.max(mv, axis=axis, keepdims=True)
    e = jnp.exp(mv - mx) * mask
    s = jnp.sum(e, axis=axis, keepdims=True) + _EPS
    return e / s


def reference_forward(params, visual_feat, rel_visual_feat, conn_map,
                      topN_boxes_scores):
    num_phrases, topN = topN_boxes_scores.shape
    N, D = visual_feat.shape
    conn_np = np.asarray(conn_map)
    sbj_ind, obj_ind = np.where(conn_np >= 0)
    conn_involved = np.unique(np.concatenate((sbj_ind // topN, obj_ind // topN)))
    inv_mask = np.zeros((N, 1), np.float32)
    for pid in range(num_phrases):
        if pid in conn_involved:
            inv_mask[pid * topN:(pid + 1) * topN, 0] = 1.0
    inv_mask = jnp.asarray(inv_mask)
    mask = jnp.asarray((conn_np >= 0).astype(np.float32))
    sbj = jnp.asarray(sbj_ind)
    obj = jnp.asarray(obj_ind)
    vj = visual_feat
    for _ in range(VISUAL_GRAPH_PASSING_TIME):
        sub = vj[sbj]
        ob = vj[obj]
        relj = jnp.concatenate([sub, ob, rel_visual_feat], 1) @ params["w_rel"].T + params["b_rel"]
        tsb = jnp.concatenate([sub, relj], 1) @ params["w_s"].T + params["b_s"]
        tob = jnp.concatenate([ob, relj], 1) @ params["w_o"].T + params["b_o"]
        atten = jnp.zeros((N, N), jnp.float32).at[sbj, obj].set(
            jnp.sum(tsb * tob, 1) / np.sqrt(D))
        w_sbj = _masked_softmax_ref(atten, mask, axis=1)
        w_obj = _masked_softmax_ref(atten, mask, axis=0)
        temp_sbj = jnp.broadcast_to(vj[:, None, :], (N, N, D))
        temp_obj = jnp.broadcast_to(vj[None, :, :], (N, N, D))
        visual_rel = jnp.zeros((N, N, D), jnp.float32).at[sbj, obj].set(relj)
        temp_sbj = jnp.concatenate([temp_sbj, visual_rel], 2)
        temp_obj = jnp.concatenate([temp_obj, visual_rel], 2)
        ctx = (temp_obj * w_sbj[:, :, None]).sum(1) + (temp_sbj * w_obj[:, :, None]).sum(0)
        upd = ctx @ params["w_ctx"].T + params["b_ctx"]
        vj = vj + inv_mask * upd
    return rel_visual_feat, vj


if __name__ == "__main__":
    num_phrases, topN, D = 4, 8, 128
    N = num_phrases * topN

    key = jax.random.PRNGKey(0)
    k1, k2, k3, kp = jax.random.split(key, 4)

    # conn_map: phrase0 -> phrase1 and phrase1 -> phrase2 boxes (diagonal pairing);
    # phrase3 is not involved in any relation (exercises the non-involved path).
    conn_map = -np.ones((N, N), dtype=np.int32)
    for i in range(topN):
        conn_map[0 * topN + i, 1 * topN + i] = 1
        conn_map[1 * topN + i, 2 * topN + i] = 1
    E = int((conn_map >= 0).sum())

    visual_feat = jax.random.normal(k1, (N, D), jnp.float32)
    rel_visual_feat = jax.random.normal(k2, (E, D), jnp.float32)
    topN_boxes_scores = jax.random.uniform(k3, (num_phrases, topN), jnp.float32)
    params = init_params(kp, D)

    rel_out, vj_out = structure_graph_forward(params, visual_feat, rel_visual_feat,
                                              conn_map, topN_boxes_scores)
    jax.block_until_ready(vj_out)

    rel_ref, vj_ref = reference_forward(params, visual_feat, rel_visual_feat,
                                        conn_map, topN_boxes_scores)
    # bf16 storage of edge-context features / one-hots vs the pure-f32 reference.
    np.testing.assert_allclose(np.asarray(vj_out), np.asarray(vj_ref),
                               rtol=2e-2, atol=2e-2)
    np.testing.assert_allclose(np.asarray(rel_out), np.asarray(rel_ref),
                               rtol=0, atol=0)
    print("KERNEL_OK")
</pallas_src>

<mosaic_0001>
module attributes {stable_mosaic.version = 11 : i64} {
  func.func private @main(%arg0: i32) attributes {dimension_semantics = [#tpu.dimension_semantics<core_parallel>], iteration_bounds = array<i64: 2>, tpu.core_type = #tpu.core_type<sc_scalar_subcore>, window_params = []} {
    return
  }
}

module attributes {stable_mosaic.version = 11 : i64} {
  func.func private @main(%arg0: i32) attributes {dimension_semantics = [#tpu.dimension_semantics<core_parallel>], iteration_bounds = array<i64: 2>, tpu.core_type = #tpu.core_type<sc_scalar_subcore>, window_params = []} {
    return
  }
}

module attributes {stable_mosaic.version = 11 : i64} {
  func.func @_edge_kernel(%arg0: i32, %arg1: memref<128x384xf32, #tpu.memory_space<vmem>>, %arg2: memref<384x128xf32, #tpu.memory_space<vmem>>, %arg3: memref<1x128xf32, #tpu.memory_space<vmem>>, %arg4: memref<128x128xf32, #tpu.memory_space<vmem>>, %arg5: memref<128x128xf32, #tpu.memory_space<vmem>>, %arg6: memref<128x256xf32, #tpu.memory_space<vmem>>, %arg7: memref<1x128xf32, #tpu.memory_space<vmem>>, %arg8: memref<1x128xf32, #tpu.memory_space<vmem>>, %arg9: memref<1x128xf32, #tpu.memory_space<vmem>>, %arg10: memref<128x256xbf16, #tpu.memory_space<vmem>>, %arg11: memref<128x256xbf16, #tpu.memory_space<vmem>>) attributes {dimension_semantics = [#tpu.dimension_semantics<parallel>], iteration_bounds = array<i64: 1>, scalar_prefetch = 0 : i64, scratch_operands = 0 : i64, tpu.core_type = #tpu.core_type<tc>, window_params = [{transform_indices = @transform_0, window_bounds = array<i64: 128, 384>}, {pipeline_mode = #tpu.pipeline_mode<synchronous>, transform_indices = @transform_1, window_bounds = array<i64: 384, 128>}, {pipeline_mode = #tpu.pipeline_mode<synchronous>, transform_indices = @transform_2, window_bounds = array<i64: 1, 128>}, {pipeline_mode = #tpu.pipeline_mode<synchronous>, transform_indices = @transform_3, window_bounds = array<i64: 128, 128>}, {pipeline_mode = #tpu.pipeline_mode<synchronous>, transform_indices = @transform_4, window_bounds = array<i64: 128, 128>}, {pipeline_mode = #tpu.pipeline_mode<synchronous>, transform_indices = @transform_5, window_bounds = array<i64: 128, 256>}, {pipeline_mode = #tpu.pipeline_mode<synchronous>, transform_indices = @transform_6, window_bounds = array<i64: 1, 128>}, {pipeline_mode = #tpu.pipeline_mode<synchronous>, transform_indices = @transform_7, window_bounds = array<i64: 1, 128>}, {transform_indices = @transform_8, window_bounds = array<i64: 1, 128>}, {transform_indices = @transform_9, window_bounds = array<i64: 128, 256>}, {transform_indices = @transform_10, window_bounds = array<i64: 128, 256>}]} {
    %c0 = arith.constant 0 : index
    %c0_0 = arith.constant 0 : index
    %0 = vector.load %arg1[%c0, %c0_0] : memref<128x384xf32, #tpu.memory_space<vmem>>, vector<128x384xf32>
    %1 = vector.extract_strided_slice %0 {offsets = [0, 0], sizes = [128, 128], strides = [1, 1]} : vector<128x384xf32> to vector<128x128xf32>
    %2 = vector.extract_strided_slice %0 {offsets = [0, 128], sizes = [128, 128], strides = [1, 1]} : vector<128x384xf32> to vector<128x128xf32>
    %c0_1 = arith.constant 0 : index
    %c0_2 = arith.constant 0 : index
    %3 = vector.load %arg2[%c0_1, %c0_2] : memref<384x128xf32, #tpu.memory_space<vmem>>, vector<384x128xf32>
    %cst = arith.constant dense<0.000000e+00> : vector<128x128xf32>
    %4 = tpu.matmul %0, %3, %cst {dimension_numbers = #tpu.dot_dimension_numbers<[1], [0], [0], [1], [0, 0, 1, 1], [], []>} : vector<128x384xf32>, vector<384x128xf32>, vector<128x128xf32> -> vector<128x128xf32>
    %c0_3 = arith.constant 0 : index
    %c0_4 = arith.constant 0 : index
    %5 = vector.load %arg3[%c0_3, %c0_4] : memref<1x128xf32, #tpu.memory_space<vmem>>, vector<1x128xf32>
    %6 = vector.broadcast %5 : vector<1x128xf32> to vector<128x128xf32>
    %7 = arith.addf %4, %6 : vector<128x128xf32>
    %c0_5 = arith.constant 0 : index
    %c0_6 = arith.constant 0 : index
    %8 = vector.load %arg6[%c0_5, %c0_6] : memref<128x256xf32, #tpu.memory_space<vmem>>, vector<128x256xf32>
    %cst_7 = arith.constant dense<0.000000e+00> : vector<128x256xf32>
    %9 = tpu.matmul %7, %8, %cst_7 {dimension_numbers = #tpu.dot_dimension_numbers<[1], [0], [0], [1], [0, 0, 1, 1], [], []>} : vector<128x128xf32>, vector<128x256xf32>, vector<128x256xf32> -> vector<128x256xf32>
    %c0_8 = arith.constant 0 : index
    %c0_9 = arith.constant 0 : index
    %10 = vector.load %arg4[%c0_8, %c0_9] : memref<128x128xf32, #tpu.memory_space<vmem>>, vector<128x128xf32>
    %cst_10 = arith.constant dense<0.000000e+00> : vector<128x128xf32>
    %11 = tpu.matmul %1, %10, %cst_10 {dimension_numbers = #tpu.dot_dimension_numbers<[1], [0], [0], [1], [0, 0, 1, 1], [], []>} : vector<128x128xf32>, vector<128x128xf32>, vector<128x128xf32> -> vector<128x128xf32>
    %12 = vector.extract_strided_slice %9 {offsets = [0, 0], sizes = [128, 128], strides = [1, 1]} : vector<128x256xf32> to vector<128x128xf32>
    %13 = arith.addf %11, %12 : vector<128x128xf32>
    %c0_11 = arith.constant 0 : index
    %c0_12 = arith.constant 0 : index
    %14 = vector.load %arg7[%c0_11, %c0_12] : memref<1x128xf32, #tpu.memory_space<vmem>>, vector<1x128xf32>
    %15 = vector.broadcast %14 : vector<1x128xf32> to vector<128x128xf32>
    %16 = arith.addf %13, %15 : vector<128x128xf32>
    %c0_13 = arith.constant 0 : index
    %c0_14 = arith.constant 0 : index
    %17 = vector.load %arg5[%c0_13, %c0_14] : memref<128x128xf32, #tpu.memory_space<vmem>>, vector<128x128xf32>
    %cst_15 = arith.constant dense<0.000000e+00> : vector<128x128xf32>
    %18 = tpu.matmul %2, %17, %cst_15 {dimension_numbers = #tpu.dot_dimension_numbers<[1], [0], [0], [1], [0, 0, 1, 1], [], []>} : vector<128x128xf32>, vector<128x128xf32>, vector<128x128xf32> -> vector<128x128xf32>
    %19 = vector.extract_strided_slice %9 {offsets = [0, 128], sizes = [128, 128], strides = [1, 1]} : vector<128x256xf32> to vector<128x128xf32>
    %20 = arith.addf %18, %19 : vector<128x128xf32>
    %c0_16 = arith.constant 0 : index
    %c0_17 = arith.constant 0 : index
    %21 = vector.load %arg8[%c0_16, %c0_17] : memref<1x128xf32, #tpu.memory_space<vmem>>, vector<1x128xf32>
    %22 = vector.broadcast %21 : vector<1x128xf32> to vector<128x128xf32>
    %23 = arith.addf %20, %22 : vector<128x128xf32>
    %24 = arith.mulf %16, %23 : vector<128x128xf32>
    %cst_18 = arith.constant 1.000000e+00 : f32
    %25 = vector.broadcast %cst_18 : f32 to vector<1x128xf32>
    %cst_19 = arith.constant dense<0.000000e+00> : vector<1x128xf32>
    %26 = tpu.matmul %25, %24, %cst_19 {dimension_numbers = #tpu.dot_dimension_numbers<[1], [1], [0], [0], [0, 0, 1, 0], [], []>} : vector<1x128xf32>, vector<128x128xf32>, vector<1x128xf32> -> vector<1x128xf32>
    %cst_20 = arith.constant 0.0883883461 : f32
    %27 = vector.broadcast %cst_20 : f32 to vector<1x128xf32>
    %28 = arith.mulf %27, %26 : vector<1x128xf32>
    %c0_21 = arith.constant 0 : index
    %c0_22 = arith.constant 0 : index
    %29 = vector.load %arg9[%c0_21, %c0_22] : memref<1x128xf32, #tpu.memory_space<vmem>>, vector<1x128xf32>
    tpu.vector_store %arg9[%c0_21, %c0_22], %28 {strides = array<i32>} : memref<1x128xf32, #tpu.memory_space<vmem>>, vector<1x128xf32>,
    %30 = tpu.concatenate %2, %7 in 1 : vector<128x128xf32>, vector<128x128xf32> -> vector<128x256xf32>
    %31 = arith.truncf %30 : vector<128x256xf32> to vector<128x256xbf16>
    %c0_23 = arith.constant 0 : index
    %c0_24 = arith.constant 0 : index
    %32 = vector.load %arg10[%c0_23, %c0_24] : memref<128x256xbf16, #tpu.memory_space<vmem>>, vector<128x256xbf16>
    tpu.vector_store %arg10[%c0_23, %c0_24], %31 {strides = array<i32>} : memref<128x256xbf16, #tpu.memory_space<vmem>>, vector<128x256xbf16>,
    %33 = tpu.concatenate %1, %7 in 1 : vector<128x128xf32>, vector<128x128xf32> -> vector<128x256xf32>
    %34 = arith.truncf %33 : vector<128x256xf32> to vector<128x256xbf16>
    %c0_25 = arith.constant 0 : index
    %c0_26 = arith.constant 0 : index
    %35 = vector.load %arg11[%c0_25, %c0_26] : memref<128x256xbf16, #tpu.memory_space<vmem>>, vector<128x256xbf16>
    tpu.vector_store %arg11[%c0_25, %c0_26], %34 {strides = array<i32>} : memref<128x256xbf16, #tpu.memory_space<vmem>>, vector<128x256xbf16>,
    return
  }
  func.func @transform_0(%arg0: i32) -> (i32, i32) {
    %c0_i32 = arith.constant 0 : i32
    %c0_i32_0 = arith.constant 0 : i32
    return %arg0, %c0_i32 : i32, i32
  }
  func.func @transform_1(%arg0: i32) -> (i32, i32) {
    %c0_i32 = arith.constant 0 : i32
    %c0_i32_0 = arith.constant 0 : i32
    %c0_i32_1 = arith.constant 0 : i32
    return %c0_i32, %c0_i32_0 : i32, i32
  }
  func.func @transform_2(%arg0: i32) -> (i32, i32) {
    %c0_i32 = arith.constant 0 : i32
    %c0_i32_0 = arith.constant 0 : i32
    %c0_i32_1 = arith.constant 0 : i32
    return %c0_i32, %c0_i32_0 : i32, i32
  }
  func.func @transform_3(%arg0: i32) -> (i32, i32) {
    %c0_i32 = arith.constant 0 : i32
    %c0_i32_0 = arith.constant 0 : i32
    %c0_i32_1 = arith.constant 0 : i32
    return %c0_i32, %c0_i32_0 : i32, i32
  }
  func.func @transform_4(%arg0: i32) -> (i32, i32) {
    %c0_i32 = arith.constant 0 : i32
    %c0_i32_0 = arith.constant 0 : i32
    %c0_i32_1 = arith.constant 0 : i32
    return %c0_i32, %c0_i32_0 : i32, i32
  }
  func.func @transform_5(%arg0: i32) -> (i32, i32) {
    %c0_i32 = arith.constant 0 : i32
    %c0_i32_0 = arith.constant 0 : i32
    %c0_i32_1 = arith.constant 0 : i32
    return %c0_i32, %c0_i32_0 : i32, i32
  }
  func.func @transform_6(%arg0: i32) -> (i32, i32) {
    %c0_i32 = arith.constant 0 : i32
    %c0_i32_0 = arith.constant 0 : i32
    %c0_i32_1 = arith.constant 0 : i32
    return %c0_i32, %c0_i32_0 : i32, i32
  }
  func.func @transform_7(%arg0: i32) -> (i32, i32) {
    %c0_i32 = arith.constant 0 : i32
    %c0_i32_0 = arith.constant 0 : i32
    %c0_i32_1 = arith.constant 0 : i32
    return %c0_i32, %c0_i32_0 : i32, i32
  }
  func.func @transform_8(%arg0: i32) -> (i32, i32) {
    %c0_i32 = arith.constant 0 : i32
    %c0_i32_0 = arith.constant 0 : i32
    return %c0_i32, %arg0 : i32, i32
  }
  func.func @transform_9(%arg0: i32) -> (i32, i32) {
    %c0_i32 = arith.constant 0 : i32
    %c0_i32_0 = arith.constant 0 : i32
    return %arg0, %c0_i32 : i32, i32
  }
  func.func @transform_10(%arg0: i32) -> (i32, i32) {
    %c0_i32 = arith.constant 0 : i32
    %c0_i32_0 = arith.constant 0 : i32
    return %arg0, %c0_i32 : i32, i32
  }
}

module attributes {stable_mosaic.version = 11 : i64} {
  func.func @_node_kernel(%arg0: i32, %arg1: memref<128x128xf32, #tpu.memory_space<vmem>>, %arg2: memref<128x1xf32, #tpu.memory_space<vmem>>, %arg3: memref<128x128xbf16, #tpu.memory_space<vmem>>, %arg4: memref<128x128xbf16, #tpu.memory_space<vmem>>, %arg5: memref<128x256xbf16, #tpu.memory_space<vmem>>, %arg6: memref<128x256xbf16, #tpu.memory_space<vmem>>, %arg7: memref<128x1xf32, #tpu.memory_space<vmem>>, %arg8: memref<128x1xf32, #tpu.memory_space<vmem>>, %arg9: memref<256x128xf32, #tpu.memory_space<vmem>>, %arg10: memref<1x128xf32, #tpu.memory_space<vmem>>, %arg11: memref<128x128xf32, #tpu.memory_space<vmem>>) attributes {dimension_semantics = [#tpu.dimension_semantics<parallel>], iteration_bounds = array<i64: 1>, scalar_prefetch = 0 : i64, scratch_operands = 0 : i64, tpu.core_type = #tpu.core_type<tc>, window_params = [{transform_indices = @transform_0, window_bounds = array<i64: 128, 128>}, {transform_indices = @transform_1, window_bounds = array<i64: 128, 1>}, {transform_indices = @transform_2, window_bounds = array<i64: 128, 128>}, {transform_indices = @transform_3, window_bounds = array<i64: 128, 128>}, {pipeline_mode = #tpu.pipeline_mode<synchronous>, transform_indices = @transform_4, window_bounds = array<i64: 128, 256>}, {pipeline_mode = #tpu.pipeline_mode<synchronous>, transform_indices = @transform_5, window_bounds = array<i64: 128, 256>}, {pipeline_mode = #tpu.pipeline_mode<synchronous>, transform_indices = @transform_6, window_bounds = array<i64: 128, 1>}, {pipeline_mode = #tpu.pipeline_mode<synchronous>, transform_indices = @transform_7, window_bounds = array<i64: 128, 1>}, {pipeline_mode = #tpu.pipeline_mode<synchronous>, transform_indices = @transform_8, window_bounds = array<i64: 256, 128>}, {pipeline_mode = #tpu.pipeline_mode<synchronous>, transform_indices = @transform_9, window_bounds = array<i64: 1, 128>}, {transform_indices = @transform_10, window_bounds = array<i64: 128, 128>}]} {
    %c0 = arith.constant 0 : index
    %c0_0 = arith.constant 0 : index
    %0 = vector.load %arg5[%c0, %c0_0] : memref<128x256xbf16, #tpu.memory_space<vmem>>, vector<128x256xbf16>
    %1 = arith.extf %0 : vector<128x256xbf16> to vector<128x256xf32>
    %c0_1 = arith.constant 0 : index
    %c0_2 = arith.constant 0 : index
    %2 = vector.load %arg7[%c0_1, %c0_2] : memref<128x1xf32, #tpu.memory_space<vmem>>, vector<128x1xf32>
    %3 = vector.broadcast %2 : vector<128x1xf32> to vector<128x256xf32>
    %4 = arith.mulf %1, %3 : vector<128x256xf32>
    %c0_3 = arith.constant 0 : index
    %c0_4 = arith.constant 0 : index
    %5 = vector.load %arg6[%c0_3, %c0_4] : memref<128x256xbf16, #tpu.memory_space<vmem>>, vector<128x256xbf16>
    %6 = arith.extf %5 : vector<128x256xbf16> to vector<128x256xf32>
    %c0_5 = arith.constant 0 : index
    %c0_6 = arith.constant 0 : index
    %7 = vector.load %arg8[%c0_5, %c0_6] : memref<128x1xf32, #tpu.memory_space<vmem>>, vector<128x1xf32>
    %8 = vector.broadcast %7 : vector<128x1xf32> to vector<128x256xf32>
    %9 = arith.mulf %6, %8 : vector<128x256xf32>
    %c0_7 = arith.constant 0 : index
    %c0_8 = arith.constant 0 : index
    %10 = vector.load %arg3[%c0_7, %c0_8] : memref<128x128xbf16, #tpu.memory_space<vmem>>, vector<128x128xbf16>
    %11 = arith.extf %10 : vector<128x128xbf16> to vector<128x128xf32>
    %cst = arith.constant dense<0.000000e+00> : vector<128x256xf32>
    %12 = tpu.matmul %11, %4, %cst {dimension_numbers = #tpu.dot_dimension_numbers<[1], [0], [0], [1], [0, 0, 1, 1], [], []>} : vector<128x128xf32>, vector<128x256xf32>, vector<128x256xf32> -> vector<128x256xf32>
    %c0_9 = arith.constant 0 : index
    %c0_10 = arith.constant 0 : index
    %13 = vector.load %arg4[%c0_9, %c0_10] : memref<128x128xbf16, #tpu.memory_space<vmem>>, vector<128x128xbf16>
    %14 = arith.extf %13 : vector<128x128xbf16> to vector<128x128xf32>
    %cst_11 = arith.constant dense<0.000000e+00> : vector<128x256xf32>
    %15 = tpu.matmul %14, %9, %cst_11 {dimension_numbers = #tpu.dot_dimension_numbers<[1], [0], [0], [1], [0, 0, 1, 1], [], []>} : vector<128x128xf32>, vector<128x256xf32>, vector<128x256xf32> -> vector<128x256xf32>
    %16 = arith.addf %12, %15 : vector<128x256xf32>
    %c0_12 = arith.constant 0 : index
    %c0_13 = arith.constant 0 : index
    %17 = vector.load %arg9[%c0_12, %c0_13] : memref<256x128xf32, #tpu.memory_space<vmem>>, vector<256x128xf32>
    %cst_14 = arith.constant dense<0.000000e+00> : vector<128x128xf32>
    %18 = tpu.matmul %16, %17, %cst_14 {dimension_numbers = #tpu.dot_dimension_numbers<[1], [0], [0], [1], [0, 0, 1, 1], [], []>} : vector<128x256xf32>, vector<256x128xf32>, vector<128x128xf32> -> vector<128x128xf32>
    %c0_15 = arith.constant 0 : index
    %c0_16 = arith.constant 0 : index
    %19 = vector.load %arg10[%c0_15, %c0_16] : memref<1x128xf32, #tpu.memory_space<vmem>>, vector<1x128xf32>
    %20 = vector.broadcast %19 : vector<1x128xf32> to vector<128x128xf32>
    %21 = arith.addf %18, %20 : vector<128x128xf32>
    %c0_17 = arith.constant 0 : index
    %c0_18 = arith.constant 0 : index
    %22 = vector.load %arg1[%c0_17, %c0_18] : memref<128x128xf32, #tpu.memory_space<vmem>>, vector<128x128xf32>
    %c0_19 = arith.constant 0 : index
    %c0_20 = arith.constant 0 : index
    %23 = vector.load %arg2[%c0_19, %c0_20] : memref<128x1xf32, #tpu.memory_space<vmem>>, vector<128x1xf32>
    %24 = vector.broadcast %23 : vector<128x1xf32> to vector<128x128xf32>
    %25 = arith.mulf %24, %21 : vector<128x128xf32>
    %26 = arith.addf %22, %25 : vector<128x128xf32>
    %c0_21 = arith.constant 0 : index
    %c0_22 = arith.constant 0 : index
    %27 = vector.load %arg11[%c0_21, %c0_22] : memref<128x128xf32, #tpu.memory_space<vmem>>, vector<128x128xf32>
    tpu.vector_store %arg11[%c0_21, %c0_22], %26 {strides = array<i32>} : memref<128x128xf32, #tpu.memory_space<vmem>>, vector<128x128xf32>,
    return
  }
  func.func @transform_0(%arg0: i32) -> (i32, i32) {
    %c0_i32 = arith.constant 0 : i32
    %c0_i32_0 = arith.constant 0 : i32
    return %arg0, %c0_i32 : i32, i32
  }
  func.func @transform_1(%arg0: i32) -> (i32, i32) {
    %c0_i32 = arith.constant 0 : i32
    %c0_i32_0 = arith.constant 0 : i32
    return %arg0, %c0_i32 : i32, i32
  }
  func.func @transform_2(%arg0: i32) -> (i32, i32) {
    %c0_i32 = arith.constant 0 : i32
    %c0_i32_0 = arith.constant 0 : i32
    return %arg0, %c0_i32 : i32, i32
  }
  func.func @transform_3(%arg0: i32) -> (i32, i32) {
    %c0_i32 = arith.constant 0 : i32
    %c0_i32_0 = arith.constant 0 : i32
    return %arg0, %c0_i32 : i32, i32
  }
  func.func @transform_4(%arg0: i32) -> (i32, i32) {
    %c0_i32 = arith.constant 0 : i32
    %c0_i32_0 = arith.constant 0 : i32
    %c0_i32_1 = arith.constant 0 : i32
    return %c0_i32, %c0_i32_0 : i32, i32
  }
  func.func @transform_5(%arg0: i32) -> (i32, i32) {
    %c0_i32 = arith.constant 0 : i32
    %c0_i32_0 = arith.constant 0 : i32
    %c0_i32_1 = arith.constant 0 : i32
    return %c0_i32, %c0_i32_0 : i32, i32
  }
  func.func @transform_6(%arg0: i32) -> (i32, i32) {
    %c0_i32 = arith.constant 0 : i32
    %c0_i32_0 = arith.constant 0 : i32
    %c0_i32_1 = arith.constant 0 : i32
    return %c0_i32, %c0_i32_0 : i32, i32
  }
  func.func @transform_7(%arg0: i32) -> (i32, i32) {
    %c0_i32 = arith.constant 0 : i32
    %c0_i32_0 = arith.constant 0 : i32
    %c0_i32_1 = arith.constant 0 : i32
    return %c0_i32, %c0_i32_0 : i32, i32
  }
  func.func @transform_8(%arg0: i32) -> (i32, i32) {
    %c0_i32 = arith.constant 0 : i32
    %c0_i32_0 = arith.constant 0 : i32
    %c0_i32_1 = arith.constant 0 : i32
    return %c0_i32, %c0_i32_0 : i32, i32
  }
  func.func @transform_9(%arg0: i32) -> (i32, i32) {
    %c0_i32 = arith.constant 0 : i32
    %c0_i32_0 = arith.constant 0 : i32
    %c0_i32_1 = arith.constant 0 : i32
    return %c0_i32, %c0_i32_0 : i32, i32
  }
  func.func @transform_10(%arg0: i32) -> (i32, i32) {
    %c0_i32 = arith.constant 0 : i32
    %c0_i32_0 = arith.constant 0 : i32
    return %arg0, %c0_i32 : i32, i32
  }
}

</mosaic_0001>

<bundles_post_ra>
// kernel: _device_forward.4
= control target key start
LH: loop header
LB: loop body
LE: loop exit
PB: predicated region body
PF: predicated region fallthrough
CT: control target
= control target key end

     0   :  { %vm1931_vm0 = vmmov 0   ;;  %s2905_s1 = inlined_call_operand.vmem [shape: f32[384,128], index: 1, kind: input, shape index: {}]   ;;  %s2906_s0 = inlined_call_operand.vmem [shape: f32[128,384], index: 0, kind: input, shape index: {}]   ;;  %s2907_s3 = inlined_call_operand.vmem [shape: f32[128,128], index: 3, kind: input, shape index: {}]   ;;  %s2908_s5 = inlined_call_operand.vmem [shape: f32[128,256], index: 5, kind: input, shape index: {}]   ;;  %s2909_s4 = inlined_call_operand.vmem [shape: f32[128,128], index: 4, kind: input, shape index: {}]   ;;  %s2910_s2 = inlined_call_operand.vmem [shape: f32[1,128], index: 2, kind: input, shape index: {}]   ;;  %s2911_s9 = inlined_call_operand.vmem [shape: bf16[128,256], index: 9, kind: output, shape index: {1}]   ;;  %s2912_s10 = inlined_call_operand.vmem [shape: bf16[128,256], index: 10, kind: output, shape index: {2}]   ;;  %s2913_s6 = inlined_call_operand.vmem [shape: f32[1,128], index: 6, kind: input, shape index: {}]   ;;  %s2914_s7 = inlined_call_operand.vmem [shape: f32[1,128], index: 7, kind: input, shape index: {}]   ;;  %s2915_s8 = inlined_call_operand.vmem [shape: f32[1,128], index: 8, kind: output, shape index: {0}]  }
   0x1   :  { %v96_v0 = vld [vmem:[%s2905_s1 + $0x80] sm:$0xff]  ;;  %v97_v1 = vld [vmem:[%s2905_s1 + $0x88] sm:$0xff]  ;;  %v98_v9 = vld [vmem:[%s2905_s1 + $0x90] sm:$0xff] }
   0x2   :  { %v80_v2 = vld [vmem:[%s2905_s1] sm:$0xff]  ;;  %v1741_v3 = vpack.c.bf16 %v97_v1, %v96_v0  ;;  %v81_v4 = vld [vmem:[%s2905_s1 + $0x8] sm:$0xff]  ;;  %v99_v10 = vld [vmem:[%s2905_s1 + $0x98] sm:$0xff] }
   0x3   :  { %v112_v5 = vld [vmem:[%s2905_s1 + $0x100] sm:$0xff]  ;;  %v113_v6 = vld [vmem:[%s2905_s1 + $0x108] sm:$0xff]  ;;  %v1743_v7 = vpack.c.bf16 %v81_v4, %v80_v2  ;;  %v82_v11 = vld [vmem:[%s2905_s1 + $0x10] sm:$0xff]  ;;  %v1745_v12 = vpack.c.bf16 %v99_v10, %v98_v9 }
   0x4   :  { %v1773_v8 = vpack.c.bf16 %v113_v6, %v112_v5  ;;  %1742 = vmatprep.subr.bf16.mxu0 %v1741_v3  ;;  %v83_v13 = vld [vmem:[%s2905_s1 + $0x18] sm:$0xff]  ;;  %v114_v14 = vld [vmem:[%s2905_s1 + $0x110] sm:$0xff]  ;;  %v100_v18 = vld [vmem:[%s2905_s1 + $0xa0] sm:$0xff] }
   0x5   :  { %v115_v15 = vld [vmem:[%s2905_s1 + $0x118] sm:$0xff]  ;;  %1744 = vmatpush3.bf16.msra.mxu0 %v1743_v7  ;;  %v1747_v16 = vpack.c.bf16 %v83_v13, %v82_v11  ;;  %v101_v19 = vld [vmem:[%s2905_s1 + $0xa8] sm:$0xff]  ;;  %v84_v20 = vld [vmem:[%s2905_s1 + $0x20] sm:$0xff] }
   0x6   :  { %1774 = vmatprep.subr.bf16.mxu1 %v1773_v8  ;;  %v1777_v17 = vpack.c.bf16 %v115_v15, %v114_v14  ;;  %1746 = vmatprep.subr.bf16.mxu0 %v1745_v12  ;;  %v1749_v21 = vpack.c.bf16 %v101_v19, %v100_v18  ;;  %v85_v22 = vld [vmem:[%s2905_s1 + $0x28] sm:$0xff]  ;;  %v116_v23 = vld [vmem:[%s2905_s1 + $0x120] sm:$0xff]  ;;  %v102_v26 = vld [vmem:[%s2905_s1 + $0xb0] sm:$0xff] }
   0x7   :  { %1776 = vmatpush3.bf16.msra.mxu1 %v1773_v8  ;;  %v117_v24 = vld [vmem:[%s2905_s1 + $0x128] sm:$0xff]  ;;  %v103_v27 = vld [vmem:[%s2905_s1 + $0xb8] sm:$0xff]  ;;  %v118_v28 = vld [vmem:[%s2905_s1 + $0x130] sm:$0xff]  ;;  %v1751_v30 = vpack.c.bf16 %v85_v22, %v84_v20 }
   0x8   :  { %1778 = vmatprep.subr.bf16.mxu1 %v1777_v17  ;;  %v1781_v25 = vpack.c.bf16 %v117_v24, %v116_v23  ;;  %v119_v29 = vld [vmem:[%s2905_s1 + $0x138] sm:$0xff]  ;;  %v1753_v31 = vpack.c.bf16 %v103_v27, %v102_v26  ;;  %v86_v32 = vld [vmem:[%s2905_s1 + $0x30] sm:$0xff]  ;;  %v104_v35 = vld [vmem:[%s2905_s1 + $0xc0] sm:$0xff] }
   0x9   :  { %1748 = vmatpush3.bf16.msra.mxu0 %v1747_v16  ;;  %v87_v33 = vld [vmem:[%s2905_s1 + $0x38] sm:$0xff]  ;;  %v1785_v34 = vpack.c.bf16 %v119_v29, %v118_v28  ;;  %v105_v36 = vld [vmem:[%s2905_s1 + $0xc8] sm:$0xff]  ;;  %v120_v37 = vld [vmem:[%s2905_s1 + $0x140] sm:$0xff] }
   0xa   :  { %1750 = vmatprep.subr.bf16.mxu0 %v1749_v21  ;;  %v121_v38 = vld [vmem:[%s2905_s1 + $0x148] sm:$0xff]  ;;  %v1755_v39 = vpack.c.bf16 %v87_v33, %v86_v32  ;;  %v1757_v40 = vpack.c.bf16 %v105_v36, %v104_v35  ;;  %v88_v41 = vld [vmem:[%s2905_s1 + $0x40] sm:$0xff]  ;;  %v106_v44 = vld [vmem:[%s2905_s1 + $0xd0] sm:$0xff] }
   0xb   :  { %1780 = vmatpush3.bf16.msra.mxu1 %v1777_v17  ;;  %v89_v42 = vld [vmem:[%s2905_s1 + $0x48] sm:$0xff]  ;;  %v1789_v43 = vpack.c.bf16 %v121_v38, %v120_v37  ;;  %v107_v45 = vld [vmem:[%s2905_s1 + $0xd8] sm:$0xff]  ;;  %v122_v46 = vld [vmem:[%s2905_s1 + $0x150] sm:$0xff] }
   0xc   :  { %1782 = vmatprep.subr.bf16.mxu1 %v1781_v25  ;;  %v123_v47 = vld [vmem:[%s2905_s1 + $0x158] sm:$0xff]  ;;  %v2093_v48 = vld [vmem:[%s2906_s0 + $0x8] sm:$0xff]  ;;  %v1759_v49 = vpack.c.bf16 %v89_v42, %v88_v41  ;;  %v34_v50 = vld [vmem:[%s2906_s0 + $0x10] sm:$0xff]  ;;  %v1761_v51 = vpack.c.bf16 %v107_v45, %v106_v44 }
   0xd   :  { %1752 = vmatpush3.bf16.msra.mxu0 %v1751_v30  ;;  %199 = vmatprep.mubr.f32.mxu0 %v2093_v48  ;;  %v90_v52 = vld [vmem:[%s2905_s1 + $0x50] sm:$0xff]  ;;  %v91_v53 = vld [vmem:[%s2905_s1 + $0x58] sm:$0xff]  ;;  %v1793_v54 = vpack.c.bf16 %v123_v47, %v122_v46  ;;  %v108_v55 = vld [vmem:[%s2905_s1 + $0xe0] sm:$0xff] }
   0xe   :  { %1754 = vmatprep.subr.bf16.mxu0 %v1753_v31  ;;  %v109_v56 = vld [vmem:[%s2905_s1 + $0xe8] sm:$0xff]  ;;  %1570 = vmatprep.mubr.f32.mxu1 %v34_v50  ;;  %v124_v57 = vld [vmem:[%s2905_s1 + $0x160] sm:$0xff]  ;;  %v1763_v59 = vpack.c.bf16 %v91_v53, %v90_v52  ;;  %v110_v0 = vld [vmem:[%s2905_s1 + $0xf0] sm:$0xff] }
   0xf   :  { %1784 = vmatpush3.bf16.msra.mxu1 %v1781_v25  ;;  %v125_v58 = vld [vmem:[%s2905_s1 + $0x168] sm:$0xff]  ;;  %v1765_v60 = vpack.c.bf16 %v109_v56, %v108_v55  ;;  %v92_v61 = vld [vmem:[%s2905_s1 + $0x60] sm:$0xff]  ;;  %v111_v1 = vld [vmem:[%s2905_s1 + $0xf8] sm:$0xff] }
  0x10   :  { %1786 = vmatprep.subr.bf16.mxu1 %v1785_v34  ;;  %v93_v62 = vld [vmem:[%s2905_s1 + $0x68] sm:$0xff]  ;;  %v1797_v63 = vpack.c.bf16 %v125_v58, %v124_v57  ;;  %v126_v2 = vld [vmem:[%s2905_s1 + $0x170] sm:$0xff]  ;;  %v127_v3 = vld [vmem:[%s2905_s1 + $0x178] sm:$0xff]  ;;  %v1769_v5 = vpack.c.bf16 %v111_v1, %v110_v0 }
  0x11   :  { %1756 = vmatpush3.bf16.msra.mxu0 %v1755_v39  ;;  %v1767_v4 = vpack.c.bf16 %v93_v62, %v92_v61  ;;  %v94_v6 = vld [vmem:[%s2905_s1 + $0x70] sm:$0xff]  ;;  %v95_v7 = vld [vmem:[%s2905_s1 + $0x78] sm:$0xff]  ;;  %v1801_v8 = vpack.c.bf16 %v127_v3, %v126_v2  ;;  %v2144_v10 = vld [vmem:[%s2906_s0] sm:$0xff] }
  0x12   :  { %1758 = vmatprep.subr.bf16.mxu0 %v1757_v40  ;;  %v1771_v9 = vpack.c.bf16 %v95_v7, %v94_v6  ;;  %v618_v11 = vld [vmem:[%s2907_s3] sm:$0xff]  ;;  %v619_v12 = vld [vmem:[%s2907_s3 + $0x8] sm:$0xff]  ;;  %v620_v13 = vld [vmem:[%s2907_s3 + $0x10] sm:$0xff] }
  0x13   :  { %1788 = vmatpush3.bf16.msra.mxu1 %v1785_v34  ;;  %v2158_v14 = vld [vmem:[%s2906_s0 + $0x20] sm:$0xff]  ;;  %v37_v15 = vld [vmem:[%s2906_s0 + $0x28] sm:$0xff]  ;;  %v1837_v16 = vpack.c.bf16 %v619_v12, %v618_v11  ;;  %v621_v17 = vld [vmem:[%s2907_s3 + $0x18] sm:$0xff] }
  0x14   :  { %1790 = vmatprep.subr.bf16.mxu1 %v1789_v43  ;;  %v40_v18 = vld [vmem:[%s2906_s0 + $0x40] sm:$0xff]  ;;  %v1841_v19 = vpack.c.bf16 %v621_v17, %v620_v13  ;;  %v623_v21 = vld [vmem:[%s2907_s3 + $0x28] sm:$0xff]  ;;  %v2180_v22 = vld [vmem:[%s2906_s0 + $0x18] sm:$0xff] }
  0x15   :  { %1760 = vmatpush3.bf16.msra.mxu0 %v1759_v49  ;;  %v622_v20 = vld [vmem:[%s2907_s3 + $0x20] sm:$0xff]  ;;  %v2185_v23 = vld [vmem:[%s2906_s0 + $0x38] sm:$0xff]  ;;  %v46_v25 = vld [vmem:[%s2906_s0 + $0x70] sm:$0xff] }
  0x16   :  { %1762 = vmatprep.subr.bf16.mxu0 %v1761_v51  ;;  %v43_v24 = vld [vmem:[%s2906_s0 + $0x58] sm:$0xff]  ;;  %v426_v26 = vld [vmem:[%s2908_s5 + $0x8] sm:$0xff]  ;;  %v1845_v28 = vpack.c.bf16 %v623_v21, %v622_v20  ;;  %v624_v29 = vld [vmem:[%s2907_s3 + $0x30] sm:$0xff] }
  0x17   :  { %1792 = vmatpush3.bf16.msra.mxu1 %v1789_v43  ;;  %v428_v27 = vld [vmem:[%s2908_s5 + $0x18] sm:$0xff]  ;;  %v425_v32 = vld [vmem:[%s2908_s5] sm:$0xff]  ;;  %v427_v33 = vld [vmem:[%s2908_s5 + $0x10] sm:$0xff] }
  0x18   :  { %1794 = vmatprep.subr.bf16.mxu1 %v1793_v54  ;;  %v625_v30 = vld [vmem:[%s2907_s3 + $0x38] sm:$0xff]  ;;  %v1805_v31 = vpack.c.bf16 %v428_v27, %v426_v26  ;;  %v430_v34 = vld [vmem:[%s2908_s5 + $0x28] sm:$0xff]  ;;  %v2222_v36 = vld [vmem:[%s2906_s0 + $0x30] sm:$0xff]  ;;  %v1807_v37 = vpack.c.bf16 %v427_v33, %v425_v32 }
  0x19   :  { %1764 = vmatpush3.bf16.msra.mxu0 %v1763_v59  ;;  %v432_v35 = vld [vmem:[%s2908_s5 + $0x38] sm:$0xff]  ;;  %v429_v38 = vld [vmem:[%s2908_s5 + $0x20] sm:$0xff]  ;;  %v2230_v39 = vld [vmem:[%s2906_s0 + $0x50] sm:$0xff]  ;;  %v1849_v43 = vpack.c.bf16 %v625_v30, %v624_v29 }
  0x1a   :  { %1766 = vmatprep.subr.bf16.mxu0 %v1765_v60  ;;  %v49_v40 = vld [vmem:[%s2906_s0 + $0x88] sm:$0xff]  ;;  %v431_v41 = vld [vmem:[%s2908_s5 + $0x30] sm:$0xff]  ;;  %v52_v42 = vld [vmem:[%s2906_s0 + $0xa0] sm:$0xff]  ;;  %v1809_v45 = vpack.c.bf16 %v432_v35, %v430_v34 }
  0x1b   :  { %1796 = vmatpush3.bf16.msra.mxu1 %v1793_v54  ;;  %v626_v44 = vld [vmem:[%s2907_s3 + $0x40] sm:$0xff]  ;;  %v627_v46 = vld [vmem:[%s2907_s3 + $0x48] sm:$0xff]  ;;  %v1811_v47 = vpack.c.bf16 %v431_v41, %v429_v38  ;;  %v436_v50 = vld [vmem:[%s2908_s5 + $0x58] sm:$0xff] }
  0x1c   :  { %1798 = vmatprep.subr.bf16.mxu1 %v1797_v63  ;;  %v434_v49 = vld [vmem:[%s2908_s5 + $0x48] sm:$0xff]  ;;  %v433_v52 = vld [vmem:[%s2908_s5 + $0x40] sm:$0xff]  ;;  %v435_v53 = vld [vmem:[%s2908_s5 + $0x50] sm:$0xff]  ;;  %v1853_v57 = vpack.c.bf16 %v627_v46, %v626_v44 }
  0x1d   :  { %1768 = vmatpush3.bf16.msra.mxu0 %v1767_v4  ;;  %v2258_v51 = vld [vmem:[%s2906_s0 + $0x48] sm:$0xff]  ;;  %v55_v55 = vld [vmem:[%s2906_s0 + $0xb8] sm:$0xff]  ;;  %v58_v56 = vld [vmem:[%s2906_s0 + $0xd0] sm:$0xff]  ;;  %v1813_v59 = vpack.c.bf16 %v436_v50, %v434_v49  ;;  %v1815_v61 = vpack.c.bf16 %v435_v53, %v433_v52 }
  0x1e   :  { %1770 = vmatprep.subr.bf16.mxu0 %v1769_v5  ;;  %v2269_v54 = vld [vmem:[%s2906_s0 + $0x68] sm:$0xff]  ;;  %v628_v58 = vld [vmem:[%s2907_s3 + $0x50] sm:$0xff]  ;;  %v629_v60 = vld [vmem:[%s2907_s3 + $0x58] sm:$0xff] }
  0x1f   :  { %1800 = vmatpush3.bf16.msra.mxu1 %v1797_v63  ;;  %v438_v62 = vld [vmem:[%s2908_s5 + $0x68] sm:$0xff]  ;;  %v440_v63 = vld [vmem:[%s2908_s5 + $0x78] sm:$0xff]  ;;  %v2294_v0 = vld [vmem:[%s2906_s0 + $0x60] sm:$0xff]  ;;  %v1857_v6 = vpack.c.bf16 %v629_v60, %v628_v58 }
  0x20   :  { %1802 = vmatprep.subr.bf16.mxu1 %v1801_v8  ;;  %v437_v1 = vld [vmem:[%s2908_s5 + $0x60] sm:$0xff]  ;;  %v439_v2 = vld [vmem:[%s2908_s5 + $0x70] sm:$0xff]  ;;  %v61_v4 = vld [vmem:[%s2906_s0 + $0xe8] sm:$0xff] }
  0x21   :  { %1772 = vmatpush3.bf16.msra.mxu0 %v1771_v9  ;;  %v2305_v3 = vld [vmem:[%s2906_s0 + $0x80] sm:$0xff]  ;;  %v631_v9 = vld [vmem:[%s2907_s3 + $0x68] sm:$0xff]  ;;  %v1819_v11 = vpack.c.bf16 %v439_v2, %v437_v1  ;;  %v444_v13 = vld [vmem:[%s2908_s5 + $0x98] sm:$0xff] }
  0x22   :  { %1838 = vmatprep.subr.bf16.mxu0 %v1837_v16  ;;  %v64_v5 = vld [vmem:[%s2906_s0 + $0x100] sm:$0xff]  ;;  %v442_v12 = vld [vmem:[%s2908_s5 + $0x88] sm:$0xff]  ;;  %v443_v17 = vld [vmem:[%s2908_s5 + $0x90] sm:$0xff] }
  0x23   :  { %1804 = vmatpush3.bf16.msra.mxu1 %v1801_v8  ;;  %v630_v7 = vld [vmem:[%s2907_s3 + $0x60] sm:$0xff]  ;;  %v1817_v8 = vpack.c.bf16 %v440_v63, %v438_v62  ;;  %v70_v20 = vld [vmem:[%s2906_s0 + $0x130] sm:$0xff]  ;;  %v633_v26 = vld [vmem:[%s2907_s3 + $0x78] sm:$0xff] }
  0x24   :  { %200 = vmatmul.mubr.f32.vlgmr.msra.gmra.mrb[0].mxu0 %v2144_v10  ;;  %1806 = vmatprep.subr.bf16.mxu1 %v1805_v31  ;;  %v1861_v21 = vpack.c.bf16 %v631_v9, %v630_v7  ;;  %v448_v29 = vld [vmem:[%s2908_s5 + $0xb8] sm:$0xff]  ;;  %v2366_v30 = vld [vmem:[%s2906_s0 + $0x90] sm:$0xff]  ;;  %v445_v31 = vld [vmem:[%s2908_s5 + $0xa0] sm:$0xff] }
  0x25   :  { %204 = vmatprep.mubr.f32.mxu0 %v2158_v14  ;;  %1840 = vmatpush3.bf16.msra.mxu0 %v1837_v16  ;;  %v441_v16 = vld [vmem:[%s2908_s5 + $0x80] sm:$0xff]  ;;  %v447_v32 = vld [vmem:[%s2908_s5 + $0xb0] sm:$0xff]  ;;  %v73_v34 = vld [vmem:[%s2906_s0 + $0x148] sm:$0xff] }
  0x26   :  { %1571 = vmatmul.mubr.f32.vlgmr.msra.gmra.mrb[0].mxu1 %v37_v15  ;;  %1842 = vmatprep.subr.bf16.mxu0 %v1841_v19  ;;  %v2330_v15 = vld [vmem:[%s2906_s0 + $0x78] sm:$0xff]  ;;  %v1823_v27 = vpack.c.bf16 %v443_v17, %v441_v16  ;;  %v2377_v33 = vld [vmem:[%s2906_s0 + $0xb0] sm:$0xff]  ;;  %v76_v35 = vld [vmem:[%s2906_s0 + $0x160] sm:$0xff] }
  0x27   :  { %1573 = vmatprep.mubr.f32.mxu1 %v40_v18  ;;  %1808 = vmatpush1.bf16.msra.mxu1 %v1807_v37  ;;  %v2341_v18 = vld [vmem:[%s2906_s0 + $0x98] sm:$0xff]  ;;  %v803_v41 = vld [vmem:[%s2909_s4 + $0x8] sm:$0xff]  ;;  %v2416_v49 = vld [vmem:[%s2906_s0 + $0xe0] sm:$0xff] }
  0x28   :  { %205 = vmatmul.mubr.f32.gmra.mrb[2].mxu0 %v2180_v22  ;;  %1810 = vmatprep.subr.bf16.mxu1 %v1809_v45  ;;  %v2401_v44 = vld [vmem:[%s2906_s0 + $0xc8] sm:$0xff]  ;;  %v79_v45 = vld [vmem:[%s2906_s0 + $0x178] sm:$0xff]  ;;  %v2435_v53 = vld [vmem:[%s2906_s0 + $0xf0] sm:$0xff] }
  0x29   :  { %209 = vmatprep.mubr.f32.mxu0 %v2185_v23  ;;  %1844 = vmatpush3.bf16.msra.mxu0 %v1841_v19  ;;  %v67_v19 = vld [vmem:[%s2906_s0 + $0x118] sm:$0xff]  ;;  %v2459_v58 = vld [vmem:[%s2906_s0 + $0x120] sm:$0xff]  ;;  %v2483_v62 = vld [vmem:[%s2906_s0 + $0x150] sm:$0xff] }
  0x2a   :  { %1574 = vmatmul.mubr.f32.gmra.mrb[2].mxu1 %v43_v24  ;;  %1846 = vmatprep.subr.bf16.mxu0 %v1845_v28  ;;  %v632_v24 = vld [vmem:[%s2907_s3 + $0x70] sm:$0xff]  ;;  %v2423_v50 = vld [vmem:[%s2906_s0 + $0xd8] sm:$0xff]  ;;  %v2495_v1 = vld [vmem:[%s2906_s0 + $0x168] sm:$0xff] }
  0x2b   :  { %1576 = vmatprep.mubr.f32.mxu1 %v46_v25  ;;  %1812 = vmatpush1.bf16.msra.mxu1 %v1811_v47  ;;  %v1821_v25 = vpack.c.bf16 %v444_v13, %v442_v12  ;;  %v1865_v37 = vpack.c.bf16 %v633_v26, %v632_v24  ;;  %v2411_v47 = vld [vmem:[%s2906_s0 + $0xc0] sm:$0xff]  ;;  %v2428_v52 = vld [vmem:[%s2906_s0 + $0xf8] sm:$0xff]  ;;  %v2488_v63 = vld [vmem:[%s2906_s0 + $0x170] sm:$0xff] }
  0x2c   :  { %210 = vmatmul.mubr.f32.gmra.mrb[4].mxu0 %v2222_v36  ;;  %1814 = vmatprep.subr.bf16.mxu1 %v1813_v59  ;;  %v2464_v59 = vld [vmem:[%s2906_s0 + $0x140] sm:$0xff]  ;;  %v2471_v60 = vld [vmem:[%s2906_s0 + $0x138] sm:$0xff]  ;;  %v804_v2 = vld [vmem:[%s2909_s4 + $0x10] sm:$0xff] }
  0x2d   :  { %214 = vmatprep.mubr.f32.mxu0 %v2230_v39  ;;  %1848 = vmatpush3.bf16.msra.mxu0 %v1845_v28  ;;  %v446_v28 = vld [vmem:[%s2908_s5 + $0xa8] sm:$0xff]  ;;  %v808_v9 = vld [vmem:[%s2909_s4 + $0x30] sm:$0xff]  ;;  %v810_v13 = vld [vmem:[%s2909_s4 + $0x40] sm:$0xff] }
  0x2e   :  { %1577 = vmatmul.mubr.f32.gmra.mrb[4].mxu1 %v49_v40  ;;  %1850 = vmatprep.subr.bf16.mxu0 %v1849_v43  ;;  %v1825_v38 = vpack.c.bf16 %v448_v29, %v446_v28  ;;  %v802_v40 = vld [vmem:[%s2909_s4] sm:$0xff]  ;;  %v807_v7 = vld [vmem:[%s2909_s4 + $0x28] sm:$0xff] }
  0x2f   :  { %1579 = vmatprep.mubr.f32.mxu1 %v52_v42  ;;  %1816 = vmatpush1.bf16.msra.mxu1 %v1815_v61  ;;  %v1827_v42 = vpack.c.bf16 %v447_v32, %v445_v31  ;;  %v1869_v46 = vpack.c.bf16 %v803_v41, %v802_v40  ;;  %v2476_v61 = vld [vmem:[%s2906_s0 + $0x158] sm:$0xff]  ;;  %v811_v16 = vld [vmem:[%s2909_s4 + $0x48] sm:$0xff]  ;;  %v814_v26 = vld [vmem:[%s2909_s4 + $0x60] sm:$0xff] }
  0x30   :  { %215 = vmatmul.mubr.f32.gmra.mrb[6].mxu0 %v2258_v51  ;;  %1818 = vmatprep.subr.bf16.mxu1 %v1817_v8  ;;  %v1885_v17 = vpack.c.bf16 %v811_v16, %v810_v13  ;;  %v450_v24 = vld [vmem:[%s2908_s5 + $0xc8] sm:$0xff]  ;;  %v449_v29 = vld [vmem:[%s2908_s5 + $0xc0] sm:$0xff]  ;;  %v451_v31 = vld [vmem:[%s2908_s5 + $0xd0] sm:$0xff] }
  0x31   :  { %219 = vmatprep.mubr.f32.mxu0 %v2269_v54  ;;  %1852 = vmatpush3.bf16.msra.mxu0 %v1849_v43  ;;  %v2396_v43 = vld [vmem:[%s2906_s0 + $0xa8] sm:$0xff]  ;;  %v817_v41 = vld [vmem:[%s2909_s4 + $0x78] sm:$0xff] }
  0x32   :  { %1580 = vmatmul.mubr.f32.gmra.mrb[6].mxu1 %v55_v55  ;;  %1854 = vmatprep.subr.bf16.mxu0 %v1853_v57  ;;  %v2440_v55 = vld [vmem:[%s2906_s0 + $0x110] sm:$0xff]  ;;  %v815_v28 = vld [vmem:[%s2909_s4 + $0x68] sm:$0xff] }
  0x33   :  { %1582 = vmatprep.mubr.f32.mxu1 %v58_v56  ;;  %1820 = vmatpush1.bf16.msra.mxu1 %v1819_v11  ;;  %v2447_v56 = vld [vmem:[%s2906_s0 + $0x108] sm:$0xff]  ;;  %v809_v11 = vld [vmem:[%s2909_s4 + $0x38] sm:$0xff]  ;;  %v1893_v32 = vpack.c.bf16 %v815_v28, %v814_v26 }
  0x34   :  { %220 = vmatmul.mubr.f32.gmra.mrb[8].mxu0 %v2294_v0  ;;  %1822 = vmatprep.subr.bf16.mxu1 %v1821_v25  ;;  %v1881_v12 = vpack.c.bf16 %v809_v11, %v808_v9  ;;  %v452_v25 = vld [vmem:[%s2908_s5 + $0xd8] sm:$0xff] }
  0x35   :  { %224 = vmatprep.mubr.f32.mxu0 %v2305_v3  ;;  %1856 = vmatpush3.bf16.msra.mxu0 %v1853_v57  ;;  %v2452_v57 = vld [vmem:[%s2906_s0 + $0x128] sm:$0xff] }
  0x36   :  { %1583 = vmatmul.mubr.f32.gmra.mrb[8].mxu1 %v61_v4  ;;  %1858 = vmatprep.subr.bf16.mxu0 %v1857_v6  ;;  %v805_v4 = vld [vmem:[%s2909_s4 + $0x18] sm:$0xff] }
  0x37   :  { %1585 = vmatprep.mubr.f32.mxu1 %v64_v5  ;;  %1824 = vmatpush1.bf16.msra.mxu1 %v1823_v27  ;;  %v1873_v5 = vpack.c.bf16 %v805_v4, %v804_v2  ;;  %v1829_v27 = vpack.c.bf16 %v452_v25, %v450_v24  ;;  %v1929_v4 = vmov 0.0  }
  0x38   :  { %225 = vmatmul.mubr.f32.gmra.mrb[10].mxu0 %v2330_v15  ;;  %1826 = vmatprep.subr.bf16.mxu1 %v1825_v38  ;;  %v816_v38 = vld [vmem:[%s2909_s4 + $0x70] sm:$0xff] }
  0x39   :  { %229 = vmatprep.mubr.f32.mxu0 %v2341_v18  ;;  %1860 = vmatpush3.bf16.msra.mxu0 %v1857_v6  ;;  %v806_v6 = vld [vmem:[%s2909_s4 + $0x20] sm:$0xff] }
  0x3a   :  { %1586 = vmatmul.mubr.f32.gmra.mrb[10].mxu1 %v67_v19  ;;  %1862 = vmatprep.subr.bf16.mxu0 %v1861_v21  ;;  %v1877_v8 = vpack.c.bf16 %v807_v7, %v806_v6  ;;  %v812_v19 = vld [vmem:[%s2909_s4 + $0x50] sm:$0xff] }
  0x3b   :  { %1588 = vmatprep.mubr.f32.mxu1 %v70_v20  ;;  %1828 = vmatpush1.bf16.msra.mxu1 %v1827_v42  ;;  %v813_v20 = vld [vmem:[%s2909_s4 + $0x58] sm:$0xff]  ;;  %v453_v42 = vld [vmem:[%s2908_s5 + $0xe0] sm:$0xff] }
  0x3c   :  { %230 = vmatmul.mubr.f32.gmra.mrb[12].mxu0 %v2366_v30  ;;  %1830 = vmatprep.subr.bf16.mxu1 %v1829_v27 }
  0x3d   :  { %234 = vmatprep.mubr.f32.mxu0 %v2377_v33  ;;  %1864 = vmatpush3.bf16.msra.mxu0 %v1861_v21  ;;  %v1889_v21 = vpack.c.bf16 %v813_v20, %v812_v19 }
  0x3e   :  { %1589 = vmatmul.mubr.f32.gmra.mrb[12].mxu1 %v73_v34  ;;  %1866 = vmatprep.subr.bf16.mxu0 %v1865_v37  ;;  %v1831_v34 = vpack.c.bf16 %v451_v31, %v449_v29 }
  0x3f   :  { %1591 = vmatprep.mubr.f32.mxu1 %v76_v35  ;;  %v454_v35 = vld [vmem:[%s2908_s5 + $0xe8] sm:$0xff] }
  0x40   :  { %235 = vmatmul.mubr.f32.gmra.mrb[14].mxu0 %v2396_v43  ;;  %1832 = vmatpush1.bf16.msra.mxu1 %v1831_v34 }
  0x41   :  { %239 = vmatprep.mubr.f32.mxu0 %v2401_v44  ;;  %1868 = vmatpush3.bf16.msra.mxu0 %v1865_v37  ;;  %v456_v37 = vld [vmem:[%s2908_s5 + $0xf8] sm:$0xff] }
  0x42   :  { %1592 = vmatmul.mubr.f32.gmra.mrb[14].mxu1 %v79_v45  ;;  %1870 = vmatprep.subr.bf16.mxu0 %v1869_v46  ;;  %v1833_v40 = vpack.c.bf16 %v456_v37, %v454_v35  ;;  %v455_v45 = vld [vmem:[%s2908_s5 + $0xf0] sm:$0xff] }
  0x43   :  { %v1835_v2 = vpack.c.bf16 %v455_v45, %v453_v42  ;;  %521 = vmatprep.mubr.f32.mxu1 %v1929_v4 }
  0x44   :  { %240 = vmatmul.mubr.f32.gmra.mrb[16].mxu0 %v2411_v47  ;;  %1834 = vmatprep.subr.bf16.mxu1 %v1833_v40 }
  0x45   :  { %244 = vmatprep.mubr.f32.mxu0 %v2416_v49  ;;  %1836 = vmatpush1.bf16.msra.mxu1 %v1835_v2 }
  0x48   :  { %245 = vmatmul.mubr.f32.gmra.mrb[18].mxu0 %v2423_v50 }
  0x49   :  { %249 = vmatprep.mubr.f32.mxu0 %v2428_v52 }
  0x4c   :  { %250 = vmatmul.mubr.f32.gmra.mrb[20].mxu0 %v2435_v53 }
  0x4d   :  { %254 = vmatprep.mubr.f32.mxu0 %v2440_v55 }
  0x50   :  { %255 = vmatmul.mubr.f32.gmra.mrb[22].mxu0 %v2447_v56 }
  0x51   :  { %259 = vmatprep.mubr.f32.mxu0 %v2452_v57 }
  0x54   :  { %260 = vmatmul.mubr.f32.gmra.mrb[24].mxu0 %v2459_v58 }
  0x55   :  { %264 = vmatprep.mubr.f32.mxu0 %v2464_v59 }
  0x58   :  { %265 = vmatmul.mubr.f32.gmra.mrb[26].mxu0 %v2471_v60 }
  0x59   :  { %269 = vmatprep.mubr.f32.mxu0 %v2476_v61 }
  0x5c   :  { %270 = vmatmul.mubr.f32.gmra.mrb[28].mxu0 %v2483_v62 }
  0x5d   :  { %274 = vmatprep.mubr.f32.mxu0 %v2488_v63 }
  0x60   :  { %275 = vmatmul.mubr.f32.gmra.mrb[30].mxu0 %v2495_v1 }
  0x61   :  { %1626 = vmatprep.mubr.f32.mxu0 %v2144_v10 }
  0x64   :  { %1627 = vmatmul.mubr.f32.vlgmr.msra.gmra.mrb[32].mxu0 %v2180_v22 }
  0x65   :  { %1872 = vmatpush3.bf16.msra.mxu0 %v1869_v46  ;;  %1629 = vmatprep.mubr.f32.mxu0 %v2222_v36  ;;  %v1897_v46 = vpack.c.bf16 %v817_v41, %v816_v38 }
  0x66   :  { %1874 = vmatprep.subr.bf16.mxu0 %v1873_v5 }
  0x68   :  { %1630 = vmatmul.mubr.f32.gmra.mrb[34].mxu0 %v2258_v51 }
  0x69   :  { %1876 = vmatpush3.bf16.msra.mxu0 %v1873_v5  ;;  %1632 = vmatprep.mubr.f32.mxu0 %v2294_v0 }
  0x6a   :  { %1878 = vmatprep.subr.bf16.mxu0 %v1877_v8 }
  0x6c   :  { %1633 = vmatmul.mubr.f32.gmra.mrb[36].mxu0 %v2330_v15 }
  0x6d   :  { %1880 = vmatpush3.bf16.msra.mxu0 %v1877_v8  ;;  %1635 = vmatprep.mubr.f32.mxu0 %v2366_v30  ;;  %v2600_v8 = vld [vmem:[%s2910_s2] ss:$0 sm:$0xff] }
  0x6e   :  { %1882 = vmatprep.subr.bf16.mxu0 %v1881_v12 }
  0x70   :  { %1636 = vmatmul.mubr.f32.gmra.mrb[38].mxu0 %v2396_v43 }
  0x71   :  { %1884 = vmatpush3.bf16.msra.mxu0 %v1881_v12  ;;  %1638 = vmatprep.mubr.f32.mxu0 %v2411_v47 }
  0x72   :  { %1886 = vmatprep.subr.bf16.mxu0 %v1885_v17 }
  0x74   :  { %1639 = vmatmul.mubr.f32.gmra.mrb[40].mxu0 %v2423_v50 }
  0x75   :  { %1888 = vmatpush3.bf16.msra.mxu0 %v1885_v17  ;;  %1641 = vmatprep.mubr.f32.mxu0 %v2435_v53 }
  0x76   :  { %1890 = vmatprep.subr.bf16.mxu0 %v1889_v21 }
  0x78   :  { %1642 = vmatmul.mubr.f32.gmra.mrb[42].mxu0 %v2447_v56 }
  0x79   :  { %1892 = vmatpush3.bf16.msra.mxu0 %v1889_v21  ;;  %1644 = vmatprep.mubr.f32.mxu0 %v2459_v58 }
  0x7a   :  { %1894 = vmatprep.subr.bf16.mxu0 %v1893_v32 }
  0x7c   :  { %1645 = vmatmul.mubr.f32.gmra.mrb[44].mxu0 %v2471_v60 }
  0x7d   :  { %1896 = vmatpush3.bf16.msra.mxu0 %v1893_v32  ;;  %1647 = vmatprep.mubr.f32.mxu0 %v2483_v62 }
  0x7e   :  { %1898 = vmatprep.subr.bf16.mxu0 %v1897_v46 }
  0x80   :  { %1648 = vmatmul.mubr.f32.gmra.mrb[46].mxu0 %v2495_v1 }
  0x81   :  { %1900 = vmatpush3.bf16.msra.mxu0 %v1897_v46  ;;  %1682 = vmatprep.mubr.f32.mxu0 %v2093_v48 }
  0x84   :  { %1683 = vmatmul.mubr.f32.vlgmr.msra.gmra.mrb[48].mxu0 %v2158_v14 }
  0x85   :  { %1685 = vmatprep.mubr.f32.mxu0 %v2185_v23 }
  0x88   :  { %1686 = vmatmul.mubr.f32.gmra.mrb[50].mxu0 %v2230_v39 }
  0x89   :  { %1688 = vmatprep.mubr.f32.mxu0 %v2269_v54 }
  0x8c   :  { %1689 = vmatmul.mubr.f32.gmra.mrb[52].mxu0 %v2305_v3 }
  0x8d   :  { %1691 = vmatprep.mubr.f32.mxu0 %v2341_v18 }
  0x90   :  { %1692 = vmatmul.mubr.f32.gmra.mrb[54].mxu0 %v2377_v33 }
  0x91   :  { %1694 = vmatprep.mubr.f32.mxu0 %v2401_v44 }
  0x94   :  { %1695 = vmatmul.mubr.f32.gmra.mrb[56].mxu0 %v2416_v49 }
  0x95   :  { %1697 = vmatprep.mubr.f32.mxu0 %v2428_v52 }
  0x98   :  { %1698 = vmatmul.mubr.f32.gmra.mrb[58].mxu0 %v2440_v55 }
  0x99   :  { %1700 = vmatprep.mubr.f32.mxu0 %v2452_v57 }
  0x9c   :  { %1701 = vmatmul.mubr.f32.gmra.mrb[60].mxu0 %v2464_v59 }
  0x9d   :  { %1703 = vmatprep.mubr.f32.mxu0 %v2476_v61 }
  0xa0   :  { %1704 = vmatmul.mubr.f32.gmra.mrb[62].mxu0 %v2488_v63 }
  0xf7   :  { %v1377_v5 = vpop.f32.mrb[0].mxu0 }
  0xf8   :  { %v1378_v6 = vpop.f32.mrb[1].mxu0 }
  0xf9   :  { %v1572_v7 = vpop.f32.mrb[0].mxu1  ;;  %v1379_v9 = vadd.f32 %v1378_v6, %v1377_v5 }
  0xfa   :  { %v346_v11 = vpop.f32.mrb[1].mxu1 }
  0xfb   :  { %v1380_v12 = vpop.f32.mrb[2].mxu0  ;;  %v202_v13 = vadd.f32 %v1379_v9, %v2600_v8 }
  0xfc   :  { %v1381_v16 = vpop.f32.mrb[3].mxu0 }
  0xfd   :  { %v1575_v17 = vpop.f32.mrb[2].mxu1  ;;  %v347_v19 = vadd.f32 %v346_v11, %v202_v13  ;;  %v1382_v20 = vadd.f32 %v1381_v16, %v1380_v12 }
  0xfe   :  { %v356_v21 = vpop.f32.mrb[3].mxu1 }
  0xff   :  { %v1313_v24 = vpack.c.bf16 %v347_v19, %v2093_v48  ;;  %v1329_v25 = vpack.c.bf16 %v347_v19, %v2144_v10  ;;  %v207_v26 = vadd.f32 %v1382_v20, %v2600_v8  ;;  %v1383_v27 = vpop.f32.mrb[4].mxu0  ;;  %522 = vmatmul.mubr.f32.vlgmr.msra.gmra.mrb[16].mxu1 %v347_v19 }
 0x100   :  { %v1384_v28 = vpop.f32.mrb[5].mxu0  ;;  %527 = vmatprep.mubr.f32.mxu1 %v1929_v4 }
 0x101   :  { %v1578_v29 = vpop.f32.mrb[4].mxu1  ;;  %1170 = vst [vmem:[%s2911_s9] sm:$0xff] %v1313_v24  ;;  %1250 = vst [vmem:[%s2912_s10] sm:$0xff] %v1329_v25  ;;  %v1385_v31 = vadd.f32 %v1384_v28, %v1383_v27  ;;  %v352_v48 = vadd.f32 %v1572_v7, %v207_v26 }
 0x102   :  { %v366_v32 = vpop.f32.mrb[5].mxu1 }
 0x103   :  { %v1386_v10 = vpop.f32.mrb[6].mxu0  ;;  %v212_v34 = vadd.f32 %v1385_v31, %v2600_v8  ;;  %528 = vmatmul.mubr.f32.gmra.mrb[18].mxu1 %v352_v48  ;;  %v1314_v35 = vpack.c.bf16 %v352_v48, %v2158_v14  ;;  %v1330_v37 = vpack.c.bf16 %v352_v48, %v2180_v22 }
 0x104   :  { %v1387_v38 = vpop.f32.mrb[7].mxu0  ;;  %533 = vmatprep.mubr.f32.mxu1 %v1929_v4 }
 0x105   :  { %v2617_v40 = vpop.f32.mrb[6].mxu1  ;;  %v357_v41 = vadd.f32 %v356_v21, %v212_v34  ;;  %1171 = vst [vmem:[%s2911_s9 + $0x8] sm:$0xff] %v1314_v35  ;;  %1251 = vst [vmem:[%s2912_s10 + $0x8] sm:$0xff] %v1330_v37  ;;  %v1388_v42 = vadd.f32 %v1387_v38, %v1386_v10 }
 0x106   :  { %v376_v45 = vpop.f32.mrb[7].mxu1 }
 0x107   :  { %v1315_v14 = vpack.c.bf16 %v357_v41, %v2185_v23  ;;  %v1331_v22 = vpack.c.bf16 %v357_v41, %v2222_v36  ;;  %v217_v46 = vadd.f32 %v1388_v42, %v2600_v8  ;;  %v1389_v2 = vpop.f32.mrb[8].mxu0  ;;  %534 = vmatmul.mubr.f32.gmra.mrb[20].mxu1 %v357_v41 }
 0x108   :  { %v1390_v5 = vpop.f32.mrb[9].mxu0  ;;  %539 = vmatprep.mubr.f32.mxu1 %v1929_v4 }
 0x109   :  { %v2629_v6 = vpop.f32.mrb[8].mxu1  ;;  %1172 = vst [vmem:[%s2911_s9 + $0x10] sm:$0xff] %v1315_v14  ;;  %1252 = vst [vmem:[%s2912_s10 + $0x10] sm:$0xff] %v1331_v22  ;;  %v1391_v23 = vadd.f32 %v1390_v5, %v1389_v2  ;;  %v362_v7 = vadd.f32 %v1575_v17, %v217_v46 }
 0x10a   :  { %v386_v36 = vpop.f32.mrb[9].mxu1 }
 0x10b   :  { %v1392_v9 = vpop.f32.mrb[10].mxu0  ;;  %v222_v11 = vadd.f32 %v1391_v23, %v2600_v8  ;;  %540 = vmatmul.mubr.f32.gmra.mrb[22].mxu1 %v362_v7  ;;  %v1316_v12 = vpack.c.bf16 %v362_v7, %v2230_v39  ;;  %v1332_v13 = vpack.c.bf16 %v362_v7, %v2258_v51 }
 0x10c   :  { %v1393_v16 = vpop.f32.mrb[11].mxu0  ;;  %545 = vmatprep.mubr.f32.mxu1 %v1929_v4 }
 0x10d   :  { %v2641_v19 = vpop.f32.mrb[10].mxu1  ;;  %v367_v20 = vadd.f32 %v366_v32, %v222_v11  ;;  %1173 = vst [vmem:[%s2911_s9 + $0x18] sm:$0xff] %v1316_v12  ;;  %1253 = vst [vmem:[%s2912_s10 + $0x18] sm:$0xff] %v1332_v13  ;;  %v1394_v17 = vadd.f32 %v1393_v16, %v1392_v9 }
 0x10e   :  { %v2649_v21 = vpop.f32.mrb[11].mxu1 }
 0x10f   :  { %v1317_v39 = vpack.c.bf16 %v367_v20, %v2269_v54  ;;  %v1333_v51 = vpack.c.bf16 %v367_v20, %v2294_v0  ;;  %v227_v24 = vadd.f32 %v1394_v17, %v2600_v8  ;;  %v1395_v25 = vpop.f32.mrb[12].mxu0  ;;  %546 = vmatmul.mubr.f32.gmra.mrb[24].mxu1 %v367_v20 }
 0x110   :  { %v1396_v26 = vpop.f32.mrb[13].mxu0  ;;  %551 = vmatprep.mubr.f32.mxu1 %v1929_v4 }
 0x111   :  { %v2655_v27 = vpop.f32.mrb[12].mxu1  ;;  %1174 = vst [vmem:[%s2911_s9 + $0x20] sm:$0xff] %v1317_v39  ;;  %1254 = vst [vmem:[%s2912_s10 + $0x20] sm:$0xff] %v1333_v51  ;;  %v1397_v54 = vadd.f32 %v1396_v26, %v1395_v25  ;;  %v372_v28 = vadd.f32 %v1578_v29, %v227_v24 }
 0x112   :  { %v2663_v0 = vpop.f32.mrb[13].mxu1 }
 0x113   :  { %v1398_v31 = vpop.f32.mrb[14].mxu0  ;;  %v232_v48 = vadd.f32 %v1397_v54, %v2600_v8  ;;  %552 = vmatmul.mubr.f32.gmra.mrb[26].mxu1 %v372_v28  ;;  %v1318_v32 = vpack.c.bf16 %v372_v28, %v2305_v3  ;;  %v1334_v10 = vpack.c.bf16 %v372_v28, %v2330_v15 }
 0x114   :  { %v1399_v34 = vpop.f32.mrb[15].mxu0  ;;  %557 = vmatprep.mubr.f32.mxu1 %v1929_v4 }
 0x115   :  { %v2669_v35 = vpop.f32.mrb[14].mxu1  ;;  %v377_v37 = vadd.f32 %v376_v45, %v232_v48  ;;  %1175 = vst [vmem:[%s2911_s9 + $0x28] sm:$0xff] %v1318_v32  ;;  %1255 = vst [vmem:[%s2912_s10 + $0x28] sm:$0xff] %v1334_v10  ;;  %v1400_v29 = vadd.f32 %v1399_v34, %v1398_v31 }
 0x116   :  { %v2677_v38 = vpop.f32.mrb[15].mxu1 }
 0x117   :  { %v1319_v3 = vpack.c.bf16 %v377_v37, %v2341_v18  ;;  %v1335_v15 = vpack.c.bf16 %v377_v37, %v2366_v30  ;;  %v237_v41 = vadd.f32 %v1400_v29, %v2600_v8  ;;  %v1401_v42 = vpop.f32.mrb[16].mxu0  ;;  %558 = vmatmul.mubr.f32.gmra.mrb[28].mxu1 %v377_v37 }
 0x118   :  { %v1402_v45 = vpop.f32.mrb[17].mxu0  ;;  %563 = vmatprep.mubr.f32.mxu1 %v1929_v4 }
 0x119   :  { %1176 = vst [vmem:[%s2911_s9 + $0x30] sm:$0xff] %v1319_v3  ;;  %1256 = vst [vmem:[%s2912_s10 + $0x30] sm:$0xff] %v1335_v15  ;;  %v1403_v14 = vadd.f32 %v1402_v45, %v1401_v42  ;;  %v382_v18 = vadd.f32 %v2617_v40, %v237_v41 }
 0x11b   :  { %v1404_v22 = vpop.f32.mrb[18].mxu0  ;;  %v242_v30 = vadd.f32 %v1403_v14, %v2600_v8  ;;  %564 = vmatmul.mubr.f32.gmra.mrb[30].mxu1 %v382_v18  ;;  %v1320_v46 = vpack.c.bf16 %v382_v18, %v2377_v33  ;;  %v1336_v2 = vpack.c.bf16 %v382_v18, %v2396_v43 }
 0x11c   :  { %v1405_v5 = vpop.f32.mrb[19].mxu0  ;;  %569 = vmatprep.mubr.f32.mxu1 %v1929_v4 }
 0x11d   :  { %v387_v23 = vadd.f32 %v386_v36, %v242_v30  ;;  %1177 = vst [vmem:[%s2911_s9 + $0x38] sm:$0xff] %v1320_v46  ;;  %1257 = vst [vmem:[%s2912_s10 + $0x38] sm:$0xff] %v1336_v2  ;;  %v1406_v40 = vadd.f32 %v1405_v5, %v1404_v22 }
 0x11f   :  { %v1321_v7 = vpack.c.bf16 %v387_v23, %v2401_v44  ;;  %v1337_v9 = vpack.c.bf16 %v387_v23, %v2411_v47  ;;  %v247_v33 = vadd.f32 %v1406_v40, %v2600_v8  ;;  %v1407_v43 = vpop.f32.mrb[20].mxu0  ;;  %570 = vmatmul.mubr.f32.gmra.mrb[32].mxu1 %v387_v23 }
 0x120   :  { %v1408_v11 = vpop.f32.mrb[21].mxu0  ;;  %575 = vmatprep.mubr.f32.mxu1 %v1929_v4 }
 0x121   :  { %1178 = vst [vmem:[%s2911_s9 + $0x40] sm:$0xff] %v1321_v7  ;;  %1258 = vst [vmem:[%s2912_s10 + $0x40] sm:$0xff] %v1337_v9  ;;  %v1409_v36 = vadd.f32 %v1408_v11, %v1407_v43  ;;  %v392_v44 = vadd.f32 %v2629_v6, %v247_v33 }
 0x123   :  { %v1410_v12 = vpop.f32.mrb[22].mxu0  ;;  %v252_v47 = vadd.f32 %v1409_v36, %v2600_v8  ;;  %576 = vmatmul.mubr.f32.gmra.mrb[34].mxu1 %v392_v44  ;;  %v1322_v13 = vpack.c.bf16 %v392_v44, %v2416_v49  ;;  %v1338_v16 = vpack.c.bf16 %v392_v44, %v2423_v50  ;;  %v1930_v36 = vmov 0.0|0.0  }
 0x124   :  { %v1411_v20 = vpop.f32.mrb[23].mxu0  ;;  %581 = vmatprep.mubr.f32.mxu1 %v1929_v4  ;;  %1901 = vmatprep.subr.bf16.mxu1 %v1930_v36 }
 0x125   :  { %v397_v17 = vadd.f32 %v2649_v21, %v252_v47  ;;  %1179 = vst [vmem:[%s2911_s9 + $0x48] sm:$0xff] %v1322_v13  ;;  %1259 = vst [vmem:[%s2912_s10 + $0x48] sm:$0xff] %v1338_v16  ;;  %v1412_v6 = vadd.f32 %v1411_v20, %v1410_v12 }
 0x127   :  { %v1323_v39 = vpack.c.bf16 %v397_v17, %v2428_v52  ;;  %v1339_v49 = vpack.c.bf16 %v397_v17, %v2435_v53  ;;  %v257_v50 = vadd.f32 %v1412_v6, %v2600_v8  ;;  %v1413_v51 = vpop.f32.mrb[24].mxu0  ;;  %582 = vmatmul.mubr.f32.gmra.mrb[36].mxu1 %v397_v17 }
 0x128   :  { %v1414_v24 = vpop.f32.mrb[25].mxu0  ;;  %587 = vmatprep.mubr.f32.mxu1 %v1929_v4 }
 0x129   :  { %1180 = vst [vmem:[%s2911_s9 + $0x50] sm:$0xff] %v1323_v39  ;;  %1260 = vst [vmem:[%s2912_s10 + $0x50] sm:$0xff] %v1339_v49  ;;  %v1415_v21 = vadd.f32 %v1414_v24, %v1413_v51  ;;  %v402_v52 = vadd.f32 %v2641_v19, %v257_v50 }
 0x12b   :  { %v1416_v25 = vpop.f32.mrb[26].mxu0  ;;  %v262_v53 = vadd.f32 %v1415_v21, %v2600_v8  ;;  %588 = vmatmul.mubr.f32.gmra.mrb[38].mxu1 %v402_v52  ;;  %v1324_v26 = vpack.c.bf16 %v402_v52, %v2440_v55  ;;  %v1340_v54 = vpack.c.bf16 %v402_v52, %v2447_v56  ;;  %v2834_v21 = vld [vmem:[%s2913_s6] ss:$0 sm:$0xff] }
 0x12c   :  { %v1417_v28 = vpop.f32.mrb[27].mxu0  ;;  %593 = vmatprep.mubr.f32.mxu1 %v1929_v4 }
 0x12d   :  { %v407_v31 = vadd.f32 %v2663_v0, %v262_v53  ;;  %1181 = vst [vmem:[%s2911_s9 + $0x58] sm:$0xff] %v1324_v26  ;;  %1261 = vst [vmem:[%s2912_s10 + $0x58] sm:$0xff] %v1340_v54  ;;  %v1418_v19 = vadd.f32 %v1417_v28, %v1416_v25  ;;  %v2839_v53 = vld [vmem:[%s2914_s7] ss:$0 sm:$0xff] }
 0x12f   :  { %v1325_v48 = vpack.c.bf16 %v407_v31, %v2452_v57  ;;  %v1341_v55 = vpack.c.bf16 %v407_v31, %v2459_v58  ;;  %v267_v56 = vadd.f32 %v1418_v19, %v2600_v8  ;;  %v1419_v32 = vpop.f32.mrb[28].mxu0  ;;  %594 = vmatmul.mubr.f32.gmra.mrb[40].mxu1 %v407_v31 }
 0x130   :  { %v1420_v10 = vpop.f32.mrb[29].mxu0  ;;  %599 = vmatprep.mubr.f32.mxu1 %v1929_v4 }
 0x131   :  { %1182 = vst [vmem:[%s2911_s9 + $0x60] sm:$0xff] %v1325_v48  ;;  %1262 = vst [vmem:[%s2912_s10 + $0x60] sm:$0xff] %v1341_v55  ;;  %v1421_v0 = vadd.f32 %v1420_v10, %v1419_v32  ;;  %v412_v57 = vadd.f32 %v2655_v27, %v267_v56 }
 0x133   :  { %v1422_v34 = vpop.f32.mrb[30].mxu0  ;;  %v272_v58 = vadd.f32 %v1421_v0, %v2600_v8  ;;  %600 = vmatmul.mubr.f32.gmra.mrb[42].mxu1 %v412_v57  ;;  %v1326_v37 = vpack.c.bf16 %v412_v57, %v2464_v59  ;;  %v1342_v29 = vpack.c.bf16 %v412_v57, %v2471_v60 }
 0x134   :  { %v1423_v3 = vpop.f32.mrb[31].mxu0  ;;  %605 = vmatprep.mubr.f32.mxu1 %v1929_v4 }
 0x135   :  { %v417_v15 = vadd.f32 %v2677_v38, %v272_v58  ;;  %1183 = vst [vmem:[%s2911_s9 + $0x68] sm:$0xff] %v1326_v37  ;;  %1263 = vst [vmem:[%s2912_s10 + $0x68] sm:$0xff] %v1342_v29  ;;  %v1424_v27 = vadd.f32 %v1423_v3, %v1422_v34 }
 0x137   :  { %v1327_v41 = vpack.c.bf16 %v417_v15, %v2476_v61  ;;  %v1343_v59 = vpack.c.bf16 %v417_v15, %v2483_v62  ;;  %v277_v60 = vadd.f32 %v1424_v27, %v2600_v8  ;;  %606 = vmatmul.mubr.f32.gmra.mrb[44].mxu1 %v417_v15  ;;  %v1628_v42 = vpop.f32.mrb[32].mxu0 }
 0x138   :  { %611 = vmatprep.mubr.f32.mxu1 %v1929_v4  ;;  %v700_v38 = vpop.f32.mrb[33].mxu0 }
 0x139   :  { %1184 = vst [vmem:[%s2911_s9 + $0x70] sm:$0xff] %v1327_v41  ;;  %1264 = vst [vmem:[%s2912_s10 + $0x70] sm:$0xff] %v1343_v59  ;;  %v422_v45 = vadd.f32 %v2669_v35, %v277_v60 }
 0x13b   :  { %612 = vmatmul.mubr.f32.gmra.mrb[46].mxu1 %v422_v45  ;;  %v1328_v61 = vpack.c.bf16 %v422_v45, %v2488_v63  ;;  %v1344_v62 = vpack.c.bf16 %v422_v45, %v2495_v1  ;;  %v1631_v8 = vpop.f32.mrb[34].mxu0 }
 0x13c   :  { %v710_v14 = vpop.f32.mrb[35].mxu0  ;;  %1738 = vmatprep.mubr.msk.f32.mxu1 %vm1931_vm0, %v1929_v4 }
 0x13d   :  { %1185 = vst [vmem:[%s2911_s9 + $0x78] sm:$0xff] %v1328_v61  ;;  %1265 = vst [vmem:[%s2912_s10 + $0x78] sm:$0xff] %v1344_v62 }
 0x13f   :  { %v2785_v18 = vpop.f32.mrb[36].mxu0 }
 0x140   :  { %v2787_v22 = vpop.f32.mrb[37].mxu0 }
 0x143   :  { %v2789_v35 = vpop.f32.mrb[38].mxu0 }
 0x144   :  { %v2791_v30 = vpop.f32.mrb[39].mxu0 }
 0x147   :  { %v2793_v63 = vpop.f32.mrb[40].mxu0 }
 0x148   :  { %v2795_v1 = vpop.f32.mrb[41].mxu0 }
 0x14b   :  { %v2797_v46 = vpop.f32.mrb[42].mxu0 }
 0x14c   :  { %v2799_v2 = vpop.f32.mrb[43].mxu0 }
 0x14f   :  { %v2801_v5 = vpop.f32.mrb[44].mxu0 }
 0x150   :  { %v2803_v23 = vpop.f32.mrb[45].mxu0 }
 0x153   :  { %v2805_v40 = vpop.f32.mrb[46].mxu0 }
 0x154   :  { %v2807_v7 = vpop.f32.mrb[47].mxu0 }
 0x157   :  { %v1684_v9 = vpop.f32.mrb[48].mxu0 }
 0x158   :  { %v884_v33 = vpop.f32.mrb[49].mxu0 }
 0x15b   :  { %v1687_v43 = vpop.f32.mrb[50].mxu0 }
 0x15c   :  { %v894_v11 = vpop.f32.mrb[51].mxu0 }
 0x15f   :  { %v1690_v44 = vpop.f32.mrb[52].mxu0 }
 0x160   :  { %v904_v12 = vpop.f32.mrb[53].mxu0 }
 0x163   :  { %v2810_v47 = vpop.f32.mrb[54].mxu0 }
 0x164   :  { %v2812_v13 = vpop.f32.mrb[55].mxu0 }
 0x167   :  { %v2814_v16 = vpop.f32.mrb[56].mxu0 }
 0x168   :  { %v2816_v20 = vpop.f32.mrb[57].mxu0 }
 0x16b   :  { %v2818_v17 = vpop.f32.mrb[58].mxu0 }
 0x16c   :  { %v2820_v6 = vpop.f32.mrb[59].mxu0 }
 0x16f   :  { %v2822_v39 = vpop.f32.mrb[60].mxu0 }
 0x170   :  { %v2824_v49 = vpop.f32.mrb[61].mxu0 }
 0x173   :  { %v2826_v50 = vpop.f32.mrb[62].mxu0 }
 0x174   :  { %v2828_v51 = vpop.f32.mrb[63].mxu0 }
 0x1d2   :  { %v523_v24 = vpop.f32.mrb[16].mxu1 }
 0x1d3   :  { %v701_v52 = vadd.f32 %v700_v38, %v523_v24  ;;  %v525_v25 = vpop.f32.mrb[17].mxu1 }
 0x1d4   :  { %v885_v26 = vadd.f32 %v884_v33, %v525_v25 }
 0x1d5   :  { %v786_v54 = vadd.f32 %v2834_v21, %v701_v52 }
 0x1d6   :  { %v970_v28 = vadd.f32 %v2839_v53, %v885_v26  ;;  %v529_v31 = vpop.f32.mrb[18].mxu1 }
 0x1d7   :  { %v706_v4 = vadd.f32 %v1628_v42, %v529_v31  ;;  %v531_v19 = vpop.f32.mrb[19].mxu1 }
 0x1d8   :  { %v986_v48 = vmul.f32 %v970_v28, %v786_v54  ;;  %v890_v55 = vadd.f32 %v1684_v9, %v531_v19 }
 0x1d9   :  { %v787_v56 = vadd.f32 %v2834_v21, %v706_v4 }
 0x1da   :  { %v971_v32 = vadd.f32 %v2839_v53, %v890_v55  ;;  %v535_v10 = vpop.f32.mrb[20].mxu1 }
 0x1db   :  { %v711_v0 = vadd.f32 %v710_v14, %v535_v10  ;;  %v537_v57 = vpop.f32.mrb[21].mxu1 }
 0x1dc   :  { %v987_v34 = vmul.f32 %v971_v32, %v787_v56  ;;  %v895_v58 = vadd.f32 %v894_v11, %v537_v57 }
 0x1dd   :  { %v788_v37 = vadd.f32 %v2834_v21, %v711_v0 }
 0x1de   :  { %v1902_v29 = vpack.c.bf16 %v987_v34, %v986_v48  ;;  %v972_v3 = vadd.f32 %v2839_v53, %v895_v58  ;;  %v541_v15 = vpop.f32.mrb[22].mxu1 }
 0x1df   :  { %v716_v27 = vadd.f32 %v1631_v8, %v541_v15  ;;  %v543_v41 = vpop.f32.mrb[23].mxu1 }
 0x1e0   :  { %v988_v59 = vmul.f32 %v972_v3, %v788_v37  ;;  %v900_v60 = vadd.f32 %v1687_v43, %v543_v41  ;;  %1903 = vmatpush3.bf16.xpose.msra.mxu1 %v1902_v29 }
 0x1e1   :  { %v789_v42 = vadd.f32 %v2834_v21, %v716_v27  ;;  %1904 = vmatprep.subr.bf16.mxu1 %v1930_v36 }
 0x1e2   :  { %v973_v38 = vadd.f32 %v2839_v53, %v900_v60  ;;  %v547_v45 = vpop.f32.mrb[24].mxu1 }
 0x1e3   :  { %v721_v61 = vadd.f32 %v2787_v22, %v547_v45  ;;  %v549_v62 = vpop.f32.mrb[25].mxu1 }
 0x1e4   :  { %v989_v14 = vmul.f32 %v973_v38, %v789_v42  ;;  %v905_v9 = vadd.f32 %v904_v12, %v549_v62 }
 0x1e5   :  { %v790_v33 = vadd.f32 %v2834_v21, %v721_v61 }
 0x1e6   :  { %v1905_v11 = vpack.c.bf16 %v989_v14, %v988_v59  ;;  %v974_v8 = vadd.f32 %v2839_v53, %v905_v9  ;;  %v553_v24 = vpop.f32.mrb[26].mxu1 }
 0x1e7   :  { %v726_v43 = vadd.f32 %v2785_v18, %v553_v24  ;;  %v555_v52 = vpop.f32.mrb[27].mxu1 }
 0x1e8   :  { %v990_v25 = vmul.f32 %v974_v8, %v790_v33  ;;  %v910_v26 = vadd.f32 %v1690_v44, %v555_v52  ;;  %1906 = vmatpush3.bf16.xpose.msra.mxu1 %v1905_v11 }
 0x1e9   :  { %v791_v54 = vadd.f32 %v2834_v21, %v726_v43  ;;  %1907 = vmatprep.subr.bf16.mxu1 %v1930_v36 }
 0x1ea   :  { %v975_v22 = vadd.f32 %v2839_v53, %v910_v26  ;;  %v559_v28 = vpop.f32.mrb[28].mxu1 }
 0x1eb   :  { %v731_v12 = vadd.f32 %v2791_v30, %v559_v28  ;;  %v561_v31 = vpop.f32.mrb[29].mxu1 }
 0x1ec   :  { %v991_v4 = vmul.f32 %v975_v22, %v791_v54  ;;  %v915_v19 = vadd.f32 %v2812_v13, %v561_v31 }
 0x1ed   :  { %v792_v48 = vadd.f32 %v2834_v21, %v731_v12 }
 0x1ee   :  { %v1908_v18 = vpack.c.bf16 %v991_v4, %v990_v25  ;;  %v976_v55 = vadd.f32 %v2839_v53, %v915_v19  ;;  %v565_v44 = vpop.f32.mrb[30].mxu1 }
 0x1ef   :  { %v736_v56 = vadd.f32 %v2789_v35, %v565_v44  ;;  %v567_v32 = vpop.f32.mrb[31].mxu1 }
 0x1f0   :  { %v992_v10 = vmul.f32 %v976_v55, %v792_v48  ;;  %v920_v0 = vadd.f32 %v2810_v47, %v567_v32  ;;  %1909 = vmatpush3.bf16.xpose.msra.mxu1 %v1908_v18 }
 0x1f1   :  { %v793_v57 = vadd.f32 %v2834_v21, %v736_v56  ;;  %1910 = vmatprep.subr.bf16.mxu1 %v1930_v36 }
 0x1f2   :  { %v977_v30 = vadd.f32 %v2839_v53, %v920_v0  ;;  %v571_v13 = vpop.f32.mrb[32].mxu1 }
 0x1f3   :  { %v741_v34 = vadd.f32 %v2795_v1, %v571_v13  ;;  %v573_v58 = vpop.f32.mrb[33].mxu1 }
 0x1f4   :  { %v993_v37 = vmul.f32 %v977_v30, %v793_v57  ;;  %v925_v29 = vadd.f32 %v2816_v20, %v573_v58 }
 0x1f5   :  { %v794_v35 = vadd.f32 %v2834_v21, %v741_v34 }
 0x1f6   :  { %v1911_v3 = vpack.c.bf16 %v993_v37, %v992_v10  ;;  %v978_v15 = vadd.f32 %v2839_v53, %v925_v29  ;;  %v577_v47 = vpop.f32.mrb[34].mxu1  ;;  %v1932_v37 = vmov 1.0  }
 0x1f7   :  { %v746_v27 = vadd.f32 %v2793_v63, %v577_v47  ;;  %v579_v41 = vpop.f32.mrb[35].mxu1 }
 0x1f8   :  { %v994_v59 = vmul.f32 %v978_v15, %v794_v35  ;;  %v930_v60 = vadd.f32 %v2814_v16, %v579_v41  ;;  %1912 = vmatpush3.bf16.xpose.msra.mxu1 %v1911_v3 }
 0x1f9   :  { %v795_v42 = vadd.f32 %v2834_v21, %v746_v27  ;;  %1913 = vmatprep.subr.bf16.mxu1 %v1930_v36 }
 0x1fa   :  { %v979_v1 = vadd.f32 %v2839_v53, %v930_v60  ;;  %v583_v20 = vpop.f32.mrb[36].mxu1 }
 0x1fb   :  { %v751_v38 = vadd.f32 %v2799_v2, %v583_v20  ;;  %v585_v45 = vpop.f32.mrb[37].mxu1 }
 0x1fc   :  { %v995_v61 = vmul.f32 %v979_v1, %v795_v42  ;;  %v935_v62 = vadd.f32 %v2820_v6, %v585_v45 }
 0x1fd   :  { %v796_v63 = vadd.f32 %v2834_v21, %v751_v38 }
 0x1fe   :  { %v1914_v14 = vpack.c.bf16 %v995_v61, %v994_v59  ;;  %v980_v9 = vadd.f32 %v2839_v53, %v935_v62  ;;  %v589_v16 = vpop.f32.mrb[38].mxu1 }
 0x1ff   :  { %v756_v33 = vadd.f32 %v2797_v46, %v589_v16  ;;  %v591_v11 = vpop.f32.mrb[39].mxu1 }
 0x200   :  { %v996_v8 = vmul.f32 %v980_v9, %v796_v63  ;;  %v940_v24 = vadd.f32 %v2818_v17, %v591_v11  ;;  %1915 = vmatpush3.bf16.xpose.msra.mxu1 %v1914_v14 }
 0x201   :  { %v797_v43 = vadd.f32 %v2834_v21, %v756_v33  ;;  %1916 = vmatprep.subr.bf16.mxu1 %v1930_v36 }
 0x202   :  { %v981_v2 = vadd.f32 %v2839_v53, %v940_v24  ;;  %v595_v6 = vpop.f32.mrb[40].mxu1 }
 0x203   :  { %v761_v52 = vadd.f32 %v2803_v23, %v595_v6  ;;  %v597_v25 = vpop.f32.mrb[41].mxu1 }
 0x204   :  { %v997_v26 = vmul.f32 %v981_v2, %v797_v43  ;;  %v945_v54 = vadd.f32 %v2824_v49, %v597_v25 }
 0x205   :  { %v798_v46 = vadd.f32 %v2834_v21, %v761_v52 }
 0x206   :  { %v1917_v22 = vpack.c.bf16 %v997_v26, %v996_v8  ;;  %v982_v28 = vadd.f32 %v2839_v53, %v945_v54  ;;  %v601_v17 = vpop.f32.mrb[42].mxu1 }
 0x207   :  { %v766_v12 = vadd.f32 %v2801_v5, %v601_v17  ;;  %v603_v31 = vpop.f32.mrb[43].mxu1 }
 0x208   :  { %v998_v4 = vmul.f32 %v982_v28, %v798_v46  ;;  %v950_v19 = vadd.f32 %v2822_v39, %v603_v31  ;;  %1918 = vmatpush3.bf16.xpose.msra.mxu1 %v1917_v22 }
 0x209   :  { %v799_v48 = vadd.f32 %v2834_v21, %v766_v12  ;;  %1919 = vmatprep.subr.bf16.mxu1 %v1930_v36 }
 0x20a   :  { %v983_v23 = vadd.f32 %v2839_v53, %v950_v19  ;;  %v607_v49 = vpop.f32.mrb[44].mxu1 }
 0x20b   :  { %v771_v18 = vadd.f32 %v2807_v7, %v607_v49  ;;  %v609_v55 = vpop.f32.mrb[45].mxu1 }
 0x20c   :  { %v999_v44 = vmul.f32 %v983_v23, %v799_v48  ;;  %v955_v56 = vadd.f32 %v2828_v51, %v609_v55 }
 0x20d   :  { %v800_v5 = vadd.f32 %v2834_v21, %v771_v18 }
 0x20e   :  { %v1920_v32 = vpack.c.bf16 %v999_v44, %v998_v4  ;;  %v984_v10 = vadd.f32 %v2839_v53, %v955_v56  ;;  %v613_v39 = vpop.f32.mrb[46].mxu1 }
 0x20f   :  { %v776_v0 = vadd.f32 %v2805_v40, %v613_v39  ;;  %v615_v57 = vpop.f32.mrb[47].mxu1 }
 0x210   :  { %v1000_v30 = vmul.f32 %v984_v10, %v800_v5  ;;  %v960_v13 = vadd.f32 %v2826_v50, %v615_v57  ;;  %1921 = vmatpush3.bf16.xpose.msra.mxu1 %v1920_v32 }
 0x211   :  { %v801_v34 = vadd.f32 %v2834_v21, %v776_v0  ;;  %1922 = vmatprep.subr.bf16.mxu1 %v1930_v36 }
 0x212   :  { %v985_v7 = vadd.f32 %v2839_v53, %v960_v13 }
 0x214   :  { %v1001_v51 = vmul.f32 %v985_v7, %v801_v34 }
 0x216   :  { %v1923_v58 = vpack.c.bf16 %v1001_v51, %v1000_v30 }
 0x218   :  { %1924 = vmatpush3.bf16.xpose.msra.mxu1 %v1923_v58 }
 0x21f   :  { %1739 = vmatmul.mubr.f32.vlgmr.msra.gmra.mrb[48].mxu1 %v1932_v37 }
 0x2f2   :  { %v1068_v29 = vpop.f32.mrb[48].mxu1 }
 0x2f3   :  { %v1072_v35 = vmul.f32 0.088388346, %v1068_v29  ;;  %v1740_v3 = vpop.f32.mrb[49].mxu1 }
 0x2f5   :  { %1073 = vst [vmem:[%s2915_s8] sm:$0x1] %v1072_v35 }

// kernel: _device_forward.5
= control target key start
LH: loop header
LB: loop body
LE: loop exit
PB: predicated region body
PF: predicated region fallthrough
CT: control target
= control target key end

     0   :  { %v1428_v0 = vmov 0   ;;  %v1429_v23 = vmov 0.0   ;;  %s2114_s7 = inlined_call_operand.vmem [shape: f32[128,1], index: 7, kind: input, shape index: {}]   ;;  %s2115_s6 = inlined_call_operand.vmem [shape: f32[128,1], index: 6, kind: input, shape index: {}]   ;;  %s2116_s1 = inlined_call_operand.vmem [shape: f32[128,1], index: 1, kind: input, shape index: {}]   ;;  %s2117_s5 = inlined_call_operand.vmem [shape: bf16[128,256], index: 5, kind: input, shape index: {}]   ;;  %s2118_s4 = inlined_call_operand.vmem [shape: bf16[128,256], index: 4, kind: input, shape index: {}]   ;;  %s2119_s8 = inlined_call_operand.vmem [shape: f32[256,128], index: 8, kind: input, shape index: {}]   ;;  %s2120_s3 = inlined_call_operand.vmem [shape: bf16[128,128], index: 3, kind: input, shape index: {}]   ;;  %s2121_s2 = inlined_call_operand.vmem [shape: bf16[128,128], index: 2, kind: input, shape index: {}]   ;;  %s2122_s9 = inlined_call_operand.vmem [shape: f32[1,128], index: 9, kind: input, shape index: {}]   ;;  %s2123_s0 = inlined_call_operand.vmem [shape: f32[128,128], index: 0, kind: input, shape index: {}]   ;;  %s2124_s10 = inlined_call_operand.vmem [shape: f32[128,128], index: 10, kind: output, shape index: {}]  }
   0x1   :  { %1427 = vset.pattern.permute.xlu1 %v1428_v0  ;;  %1426 = vset.pattern.permute.xlu0 %v1428_v0  ;;  %v261_v1 = vld [vmem:[%s2114_s7 + $0x10] sm:$0xff]  ;;  %v259_v2 = vld [vmem:[%s2114_s7] sm:$0xff]  ;;  %v262_v3 = vld [vmem:[%s2114_s7 + $0x18] sm:$0xff] }
   0x2   :  { %287 = vperm.xlu1 %1427, %v261_v1   ;;  %277 = vperm.xlu0 %1426, %v259_v2   ;;  %v260_v4 = vld [vmem:[%s2114_s7 + $0x8] sm:$0xff]  ;;  %v263_v6 = vld [vmem:[%s2114_s7 + $0x20] sm:$0xff]  ;;  %v266_v7 = vld [vmem:[%s2114_s7 + $0x38] sm:$0xff] }
   0x3   :  { %v264_v5 = vld [vmem:[%s2114_s7 + $0x28] sm:$0xff]  ;;  %v265_v8 = vld [vmem:[%s2114_s7 + $0x30] sm:$0xff]  ;;  %v267_v10 = vld [vmem:[%s2114_s7 + $0x40] sm:$0xff]  ;;  %515 = vmatprep.mubr.f32.mxu0 %v1429_v23  ;;  %563 = vmatprep.mubr.f32.mxu1 %v1429_v23 }
   0x4   :  { %v268_v9 = vld [vmem:[%s2114_s7 + $0x48] sm:$0xff]  ;;  %v270_v11 = vld [vmem:[%s2114_s7 + $0x58] sm:$0xff]  ;;  %v269_v12 = vld [vmem:[%s2114_s7 + $0x50] sm:$0xff] }
   0x5   :  { %v272_v13 = vld [vmem:[%s2114_s7 + $0x68] sm:$0xff]  ;;  %v271_v14 = vld [vmem:[%s2114_s7 + $0x60] sm:$0xff]  ;;  %v274_v15 = vld [vmem:[%s2114_s7 + $0x78] sm:$0xff] }
   0x6   :  { %292 = vperm.xlu1 %1427, %v262_v3   ;;  %282 = vperm.xlu0 %1426, %v260_v4   ;;  %v273_v16 = vld [vmem:[%s2114_s7 + $0x70] sm:$0xff]  ;;  %v84_v17 = vld [vmem:[%s2115_s6 + $0x8] sm:$0xff]  ;;  %v83_v18 = vld [vmem:[%s2115_s6] sm:$0xff] }
   0x7   :  { %v86_v19 = vld [vmem:[%s2115_s6 + $0x18] sm:$0xff]  ;;  %v85_v20 = vld [vmem:[%s2115_s6 + $0x10] sm:$0xff]  ;;  %v88_v21 = vld [vmem:[%s2115_s6 + $0x28] sm:$0xff] }
   0x8   :  { %v87_v22 = vld [vmem:[%s2115_s6 + $0x20] sm:$0xff]  ;;  %v90_v24 = vld [vmem:[%s2115_s6 + $0x38] sm:$0xff]  ;;  %v89_v25 = vld [vmem:[%s2115_s6 + $0x30] sm:$0xff] }
   0x9   :  { %v92_v26 = vld [vmem:[%s2115_s6 + $0x48] sm:$0xff]  ;;  %v91_v27 = vld [vmem:[%s2115_s6 + $0x40] sm:$0xff]  ;;  %v94_v28 = vld [vmem:[%s2115_s6 + $0x58] sm:$0xff] }
   0xa   :  { %302 = vperm.xlu1 %1427, %v264_v5   ;;  %297 = vperm.xlu0 %1426, %v263_v6   ;;  %v93_v29 = vld [vmem:[%s2115_s6 + $0x50] sm:$0xff]  ;;  %v96_v30 = vld [vmem:[%s2115_s6 + $0x68] sm:$0xff]  ;;  %v95_v31 = vld [vmem:[%s2115_s6 + $0x60] sm:$0xff] }
   0xb   :  { %v98_v32 = vld [vmem:[%s2115_s6 + $0x78] sm:$0xff]  ;;  %v97_v33 = vld [vmem:[%s2115_s6 + $0x70] sm:$0xff]  ;;  %v974_v34 = vld [vmem:[%s2116_s1 + $0x8] sm:$0xff] }
   0xc   :  { %v973_v35 = vld [vmem:[%s2116_s1] sm:$0xff]  ;;  %v976_v36 = vld [vmem:[%s2116_s1 + $0x18] sm:$0xff]  ;;  %v975_v37 = vld [vmem:[%s2116_s1 + $0x10] sm:$0xff] }
   0xd   :  { %v978_v38 = vld [vmem:[%s2116_s1 + $0x28] sm:$0xff]  ;;  %v977_v39 = vld [vmem:[%s2116_s1 + $0x20] sm:$0xff]  ;;  %v980_v40 = vld [vmem:[%s2116_s1 + $0x38] sm:$0xff] }
   0xe   :  { %312 = vperm.xlu1 %1427, %v266_v7   ;;  %307 = vperm.xlu0 %1426, %v265_v8   ;;  %v979_v41 = vld [vmem:[%s2116_s1 + $0x30] sm:$0xff]  ;;  %v982_v42 = vld [vmem:[%s2116_s1 + $0x48] sm:$0xff]  ;;  %v981_v43 = vld [vmem:[%s2116_s1 + $0x40] sm:$0xff] }
   0xf   :  { %v984_v44 = vld [vmem:[%s2116_s1 + $0x58] sm:$0xff]  ;;  %v983_v45 = vld [vmem:[%s2116_s1 + $0x50] sm:$0xff]  ;;  %v986_v46 = vld [vmem:[%s2116_s1 + $0x68] sm:$0xff] }
  0x10   :  { %v985_v47 = vld [vmem:[%s2116_s1 + $0x60] sm:$0xff]  ;;  %v988_v48 = vld [vmem:[%s2116_s1 + $0x78] sm:$0xff]  ;;  %v987_v49 = vld [vmem:[%s2116_s1 + $0x70] sm:$0xff] }
  0x11   :  { %v213_v50 = vld [vmem:[%s2117_s5 + $0x10] sm:$0xff]  ;;  %v211_v51 = vld [vmem:[%s2117_s5] sm:$0xff]  ;;  %v214_v52 = vld [vmem:[%s2117_s5 + $0x18] sm:$0xff] }
  0x12   :  { %322 = vperm.xlu1 %1427, %v268_v9   ;;  %317 = vperm.xlu0 %1426, %v267_v10   ;;  %v212_v53 = vld [vmem:[%s2117_s5 + $0x8] sm:$0xff]  ;;  %v232_v55 = vunpack.c.h.bf16 %v213_v50  ;;  %v227_v57 = vunpack.c.l.bf16 %v211_v51  ;;  %v228_v58 = vunpack.c.h.bf16 %v211_v51  ;;  %v234_v59 = vunpack.c.h.bf16 %v214_v52  ;;  %v215_v63 = vld [vmem:[%s2117_s5 + $0x20] sm:$0xff] }
  0x13   :  { %v229_v60 = vunpack.c.l.bf16 %v212_v53  ;;  %v230_v61 = vunpack.c.h.bf16 %v212_v53  ;;  %v216_v62 = vld [vmem:[%s2117_s5 + $0x28] sm:$0xff]  ;;  %v231_v0 = vunpack.c.l.bf16 %v213_v50  ;;  %v233_v1 = vunpack.c.l.bf16 %v214_v52 }
  0x14   :  { %v238_v6 = vunpack.c.h.bf16 %v216_v62  ;;  %v236_v7 = vunpack.c.h.bf16 %v215_v63 }
  0x16   :  { %332 = vperm.xlu1 %1427, %v270_v11   ;;  %327 = vperm.xlu0 %1426, %v269_v12   ;;  %v218_v12 = vld [vmem:[%s2117_s5 + $0x38] sm:$0xff] }
  0x1a   :  { %342 = vperm.xlu1 %1427, %v272_v13   ;;  %337 = vperm.xlu0 %1426, %v271_v14   ;;  %v217_v13 = vld [vmem:[%s2117_s5 + $0x30] sm:$0xff]  ;;  %v237_v14 = vunpack.c.l.bf16 %v216_v62 }
  0x1e   :  { %352 = vperm.xlu1 %1427, %v274_v15   ;;  %347 = vperm.xlu0 %1426, %v273_v16  }
  0x22   :  { %106 = vperm.xlu1 %1427, %v84_v17   ;;  %101 = vperm.xlu0 %1426, %v83_v18  }
  0x26   :  { %116 = vperm.xlu1 %1427, %v86_v19   ;;  %111 = vperm.xlu0 %1426, %v85_v20  }
  0x2a   :  { %126 = vperm.xlu1 %1427, %v88_v21   ;;  %121 = vperm.xlu0 %1426, %v87_v22   ;;  %v235_v21 = vunpack.c.l.bf16 %v215_v63  ;;  %v242_v22 = vunpack.c.h.bf16 %v218_v12 }
  0x2e   :  { %136 = vperm.xlu1 %1427, %v90_v24   ;;  %131 = vperm.xlu0 %1426, %v89_v25  }
  0x32   :  { %146 = vperm.xlu1 %1427, %v92_v26   ;;  %141 = vperm.xlu0 %1426, %v91_v27   ;;  %v240_v27 = vunpack.c.h.bf16 %v217_v13 }
  0x36   :  { %156 = vperm.xlu1 %1427, %v94_v28   ;;  %151 = vperm.xlu0 %1426, %v93_v29   ;;  %v220_v28 = vld [vmem:[%s2117_s5 + $0x48] sm:$0xff]  ;;  %v219_v29 = vld [vmem:[%s2117_s5 + $0x40] sm:$0xff] }
  0x3a   :  { %166 = vperm.xlu1 %1427, %v96_v30   ;;  %161 = vperm.xlu0 %1426, %v95_v31   ;;  %v241_v30 = vunpack.c.l.bf16 %v218_v12  ;;  %v239_v31 = vunpack.c.l.bf16 %v217_v13 }
  0x3e   :  { %176 = vperm.xlu1 %1427, %v98_v32   ;;  %171 = vperm.xlu0 %1426, %v97_v33  }
  0x42   :  { %996 = vperm.xlu1 %1427, %v974_v34   ;;  %991 = vperm.xlu0 %1426, %v973_v35  }
  0x46   :  { %1006 = vperm.xlu1 %1427, %v976_v36   ;;  %1001 = vperm.xlu0 %1426, %v975_v37   ;;  %v246_v37 = vunpack.c.h.bf16 %v220_v28 }
  0x4a   :  { %1016 = vperm.xlu1 %1427, %v978_v38   ;;  %1011 = vperm.xlu0 %1426, %v977_v39  }
  0x4e   :  { %1026 = vperm.xlu1 %1427, %v980_v40   ;;  %1021 = vperm.xlu0 %1426, %v979_v41   ;;  %v244_v41 = vunpack.c.h.bf16 %v219_v29 }
  0x52   :  { %1036 = vperm.xlu1 %1427, %v982_v42   ;;  %1031 = vperm.xlu0 %1426, %v981_v43   ;;  %v222_v42 = vld [vmem:[%s2117_s5 + $0x58] sm:$0xff]  ;;  %v221_v43 = vld [vmem:[%s2117_s5 + $0x50] sm:$0xff] }
  0x53   :  { %v250_v51 = vunpack.c.h.bf16 %v222_v42 }
  0x56   :  { %1046 = vperm.xlu1 %1427, %v984_v44   ;;  %1041 = vperm.xlu0 %1426, %v983_v45   ;;  %v245_v44 = vunpack.c.l.bf16 %v220_v28  ;;  %v243_v45 = vunpack.c.l.bf16 %v219_v29 }
  0x5a   :  { %1056 = vperm.xlu1 %1427, %v986_v46   ;;  %1051 = vperm.xlu0 %1426, %v985_v47  }
  0x5e   :  { %1066 = vperm.xlu1 %1427, %v988_v48   ;;  %1061 = vperm.xlu0 %1426, %v987_v49  }
  0x81   :  { %v288_v54 = vpop.permute.xlu1 %287  ;;  %v278_v56 = vpop.permute.xlu0 %277 }
  0x82   :  { %v360_v2 = vmul.f32 %v288_v54, %v232_v55  ;;  %v355_v3 = vmul.f32 %v278_v56, %v227_v57  ;;  %v356_v8 = vmul.f32 %v278_v56, %v228_v58  ;;  %v359_v17 = vmul.f32 %v288_v54, %v231_v0  ;;  %v224_v56 = vld [vmem:[%s2117_s5 + $0x68] sm:$0xff]  ;;  %v223_v57 = vld [vmem:[%s2117_s5 + $0x60] sm:$0xff] }
  0x83   :  { %v248_v55 = vunpack.c.h.bf16 %v221_v43  ;;  %v249_v58 = vunpack.c.l.bf16 %v222_v42 }
  0x85   :  { %v293_v4 = vpop.permute.xlu1 %292  ;;  %v283_v5 = vpop.permute.xlu0 %282 }
  0x86   :  { %v362_v9 = vmul.f32 %v293_v4, %v234_v59  ;;  %v357_v10 = vmul.f32 %v283_v5, %v229_v60  ;;  %v358_v11 = vmul.f32 %v283_v5, %v230_v61  ;;  %v361_v18 = vmul.f32 %v293_v4, %v233_v1 }
  0x87   :  { %v247_v59 = vunpack.c.l.bf16 %v221_v43  ;;  %v254_v1 = vunpack.c.h.bf16 %v224_v56  ;;  %v252_v5 = vunpack.c.h.bf16 %v223_v57 }
  0x88   :  { %v1280_v15 = vpack.c.bf16 %v358_v11, %v356_v8  ;;  %v1282_v16 = vpack.c.bf16 %v357_v10, %v355_v3  ;;  %v1284_v24 = vpack.c.bf16 %v362_v9, %v360_v2  ;;  %v1286_v32 = vpack.c.bf16 %v361_v18, %v359_v17 }
  0x89   :  { %v303_v19 = vpop.permute.xlu1 %302  ;;  %v298_v20 = vpop.permute.xlu0 %297  ;;  %v253_v8 = vunpack.c.l.bf16 %v224_v56  ;;  %v251_v9 = vunpack.c.l.bf16 %v223_v57 }
  0x8a   :  { %v366_v25 = vmul.f32 %v303_v19, %v238_v6  ;;  %v364_v26 = vmul.f32 %v298_v20, %v236_v7  ;;  %1281 = vmatprep.subr.bf16.mxu0 %v1280_v15  ;;  %1376 = vmatprep.subr.bf16.mxu1 %v1280_v15  ;;  %v365_v33 = vmul.f32 %v303_v19, %v237_v14  ;;  %v226_v6 = vld [vmem:[%s2117_s5 + $0x78] sm:$0xff]  ;;  %v225_v7 = vld [vmem:[%s2117_s5 + $0x70] sm:$0xff] }
  0x8b   :  { %1283 = vmatpush1.bf16.msra.mxu0 %v1282_v16  ;;  %1384 = vmatpush1.bf16.msra.mxu1 %v1282_v16  ;;  %v363_v34 = vmul.f32 %v298_v20, %v235_v21  ;;  %v258_v15 = vunpack.c.h.bf16 %v226_v6  ;;  %v256_v19 = vunpack.c.h.bf16 %v225_v7  ;;  %v36_v20 = vld [vmem:[%s2118_s4 + $0x8] sm:$0xff]  ;;  %v35_v21 = vld [vmem:[%s2118_s4] sm:$0xff] }
  0x8c   :  { %1285 = vmatprep.subr.bf16.mxu0 %v1284_v24  ;;  %1377 = vmatprep.subr.bf16.mxu1 %v1284_v24  ;;  %v1288_v38 = vpack.c.bf16 %v366_v25, %v364_v26  ;;  %v255_v24 = vunpack.c.l.bf16 %v225_v7  ;;  %v773_v7 = vld [vmem:[%s2119_s8] sm:$0xff] }
  0x8d   :  { %v313_v35 = vpop.permute.xlu1 %312  ;;  %v308_v36 = vpop.permute.xlu0 %307  ;;  %v1290_v46 = vpack.c.bf16 %v365_v33, %v363_v34  ;;  %v52_v34 = vunpack.c.h.bf16 %v35_v21 }
  0x8e   :  { %v370_v39 = vmul.f32 %v313_v35, %v242_v22  ;;  %v368_v40 = vmul.f32 %v308_v36, %v240_v27  ;;  %v369_v47 = vmul.f32 %v313_v35, %v241_v30  ;;  %v367_v48 = vmul.f32 %v308_v36, %v239_v31  ;;  %v38_v35 = vld [vmem:[%s2118_s4 + $0x18] sm:$0xff]  ;;  %v37_v36 = vld [vmem:[%s2118_s4 + $0x10] sm:$0xff] }
  0x8f   :  { %1287 = vmatpush1.bf16.msra.mxu0 %v1286_v32  ;;  %1385 = vmatpush1.bf16.msra.mxu1 %v1286_v32  ;;  %v257_v22 = vunpack.c.l.bf16 %v226_v6  ;;  %v54_v30 = vunpack.c.h.bf16 %v36_v20 }
  0x90   :  { %1289 = vmatprep.subr.bf16.mxu0 %v1288_v38  ;;  %1378 = vmatprep.subr.bf16.mxu1 %v1288_v38  ;;  %v1292_v52 = vpack.c.bf16 %v370_v39, %v368_v40  ;;  %v1294_v60 = vpack.c.bf16 %v369_v47, %v367_v48  ;;  %v51_v38 = vunpack.c.l.bf16 %v35_v21  ;;  %v791_v21 = vld [vmem:[%s2119_s8 + $0x90] sm:$0xff] }
  0x91   :  { %v323_v49 = vpop.permute.xlu1 %322  ;;  %v318_v50 = vpop.permute.xlu0 %317 }
  0x92   :  { %v374_v53 = vmul.f32 %v323_v49, %v246_v37  ;;  %v372_v54 = vmul.f32 %v318_v50, %v244_v41  ;;  %v373_v61 = vmul.f32 %v323_v49, %v245_v44  ;;  %v371_v62 = vmul.f32 %v318_v50, %v243_v45  ;;  %v1694_v45 = vld [vmem:[%s2118_s4 + $0x28] sm:$0xff] }
  0x93   :  { %1291 = vmatpush1.bf16.msra.mxu0 %v1290_v46  ;;  %1386 = vmatpush1.bf16.msra.mxu1 %v1290_v46  ;;  %v53_v37 = vunpack.c.l.bf16 %v36_v20  ;;  %v58_v44 = vunpack.c.h.bf16 %v38_v35  ;;  %v1699_v46 = vld [vmem:[%s2118_s4 + $0x20] sm:$0xff]  ;;  %v56_v50 = vunpack.c.h.bf16 %v37_v36  ;;  %v62_v56 = vunpack.c.h.bf16 %v1694_v45 }
  0x94   :  { %1293 = vmatprep.subr.bf16.mxu0 %v1292_v52  ;;  %1379 = vmatprep.subr.bf16.mxu1 %v1292_v52  ;;  %v1296_v2 = vpack.c.bf16 %v374_v53, %v372_v54  ;;  %v1298_v10 = vpack.c.bf16 %v373_v61, %v371_v62  ;;  %v790_v52 = vld [vmem:[%s2119_s8 + $0x88] sm:$0xff]  ;;  %v1710_v53 = vld [vmem:[%s2120_s3] sm:$0xff]   ;;  %v57_v54 = vunpack.c.l.bf16 %v38_v35  ;;  %v60_v57 = vunpack.c.h.bf16 %v1699_v46 }
  0x95   :  { %v333_v63 = vpop.permute.xlu1 %332  ;;  %v328_v0 = vpop.permute.xlu0 %327  ;;  %v1156_v6 = vunpack.c.l.bf16 %v1710_v53 }
  0x96   :  { %v378_v3 = vmul.f32 %v333_v63, %v250_v51  ;;  %v376_v4 = vmul.f32 %v328_v0, %v248_v55  ;;  %v377_v11 = vmul.f32 %v333_v63, %v249_v58  ;;  %v375_v12 = vmul.f32 %v328_v0, %v247_v59  ;;  %v789_v51 = vld [vmem:[%s2119_s8 + $0x80] sm:$0xff]  ;;  %v1717_v63 = vld [vmem:[%s2118_s4 + $0x38] sm:$0xff]  ;;  %v1722_v0 = vld [vmem:[%s2118_s4 + $0x30] sm:$0xff] }
  0x97   :  { %1295 = vmatpush1.bf16.msra.mxu0 %v1294_v60  ;;  %1387 = vmatpush1.bf16.msra.mxu1 %v1294_v60  ;;  %v55_v55 = vunpack.c.l.bf16 %v37_v36 }
  0x98   :  { %1297 = vmatprep.subr.bf16.mxu0 %v1296_v2  ;;  %1380 = vmatprep.subr.bf16.mxu1 %v1296_v2  ;;  %v1300_v16 = vpack.c.bf16 %v378_v3, %v376_v4  ;;  %v1302_v25 = vpack.c.bf16 %v377_v11, %v375_v12  ;;  %v1344_v2 = vpack.c.bf16 %v790_v52, %v789_v51  ;;  %v66_v11 = vunpack.c.h.bf16 %v1717_v63 }
  0x99   :  { %v343_v13 = vpop.permute.xlu1 %342  ;;  %v338_v14 = vpop.permute.xlu0 %337  ;;  %v64_v12 = vunpack.c.h.bf16 %v1722_v0 }
  0x9a   :  { %v382_v17 = vmul.f32 %v343_v13, %v254_v1  ;;  %v380_v18 = vmul.f32 %v338_v14, %v252_v5  ;;  %v381_v26 = vmul.f32 %v343_v13, %v253_v8  ;;  %v379_v27 = vmul.f32 %v338_v14, %v251_v9  ;;  %v1727_v1 = vld [vmem:[%s2120_s3 + $0x20] sm:$0xff]   ;;  %v774_v8 = vld [vmem:[%s2119_s8 + $0x8] sm:$0xff] }
  0x9b   :  { %1299 = vmatpush1.bf16.msra.mxu0 %v1298_v10  ;;  %1388 = vmatpush1.bf16.msra.mxu1 %v1298_v10  ;;  %v61_v9 = vunpack.c.l.bf16 %v1694_v45  ;;  %v59_v10 = vunpack.c.l.bf16 %v1699_v46  ;;  %v1172_v13 = vunpack.c.l.bf16 %v1727_v1  ;;  %v1346_v20 = vpack.c.bf16 %v774_v8, %v773_v7 }
  0x9c   :  { %1301 = vmatprep.subr.bf16.mxu0 %v1300_v16  ;;  %1381 = vmatprep.subr.bf16.mxu1 %v1300_v16  ;;  %v1304_v31 = vpack.c.bf16 %v382_v17, %v380_v18  ;;  %v1306_v39 = vpack.c.bf16 %v381_v26, %v379_v27  ;;  %v1157_v27 = vunpack.c.h.bf16 %v1710_v53 }
  0x9d   :  { %v353_v28 = vpop.permute.xlu1 %352  ;;  %v348_v29 = vpop.permute.xlu0 %347 }
  0x9e   :  { %v386_v32 = vmul.f32 %v353_v28, %v258_v15  ;;  %v384_v33 = vmul.f32 %v348_v29, %v256_v19  ;;  %v385_v40 = vmul.f32 %v353_v28, %v257_v22  ;;  %v383_v41 = vmul.f32 %v348_v29, %v255_v24  ;;  %v1744_v19 = vld [vmem:[%s2118_s4 + $0x48] sm:$0xff]  ;;  %v792_v22 = vld [vmem:[%s2119_s8 + $0x98] sm:$0xff]  ;;  %v1756_v28 = vld [vmem:[%s2118_s4 + $0x40] sm:$0xff] }
  0x9f   :  { %1303 = vmatpush1.bf16.msra.mxu0 %v1302_v25  ;;  %1389 = vmatpush1.bf16.msra.mxu1 %v1302_v25  ;;  %v65_v29 = vunpack.c.l.bf16 %v1717_v63  ;;  %v1348_v35 = vpack.c.bf16 %v792_v22, %v791_v21  ;;  %v67_v51 = vunpack.c.l.bf16 %v1756_v28  ;;  %v794_v63 = vld [vmem:[%s2119_s8 + $0xa8] sm:$0xff] }
  0xa0   :  { %1305 = vmatprep.subr.bf16.mxu0 %v1304_v31  ;;  %1382 = vmatprep.subr.bf16.mxu1 %v1304_v31  ;;  %v1308_v47 = vpack.c.bf16 %v386_v32, %v384_v33  ;;  %v1310_v58 = vpack.c.bf16 %v385_v40, %v383_v41  ;;  %v63_v31 = vunpack.c.l.bf16 %v1722_v0  ;;  %v70_v32 = vunpack.c.h.bf16 %v1744_v19  ;;  %v1770_v33 = vld [vmem:[%s2118_s4 + $0x58] sm:$0xff] }
  0xa1   :  { %v107_v42 = vpop.permute.xlu1 %106  ;;  %v102_v43 = vpop.permute.xlu0 %101  ;;  %v68_v41 = vunpack.c.h.bf16 %v1756_v28  ;;  %v74_v52 = vunpack.c.h.bf16 %v1770_v33 }
  0xa2   :  { %v182_v48 = vmul.f32 %v107_v42, %v54_v30  ;;  %v180_v49 = vmul.f32 %v102_v43, %v52_v34  ;;  %v181_v59 = vmul.f32 %v107_v42, %v53_v37  ;;  %v179_v60 = vmul.f32 %v102_v43, %v51_v38  ;;  %v1763_v30 = vld [vmem:[%s2120_s3 + $0x8] sm:$0xff]   ;;  %v775_v43 = vld [vmem:[%s2119_s8 + $0x10] sm:$0xff] }
  0xa3   :  { %1307 = vmatpush1.bf16.msra.mxu0 %v1306_v39  ;;  %1390 = vmatpush1.bf16.msra.mxu1 %v1306_v39  ;;  %v1173_v34 = vunpack.c.h.bf16 %v1727_v1  ;;  %v1778_v42 = vld [vmem:[%s2120_s3 + $0x28] sm:$0xff]  }
  0xa4   :  { %1309 = vmatprep.subr.bf16.mxu0 %v1308_v47  ;;  %1383 = vmatprep.subr.bf16.mxu1 %v1308_v47  ;;  %v1312_v3 = vpack.c.bf16 %v182_v48, %v180_v49  ;;  %v1314_v14 = vpack.c.bf16 %v181_v59, %v179_v60  ;;  %v1160_v48 = vunpack.c.l.bf16 %v1763_v30  ;;  %v1790_v49 = vld [vmem:[%s2118_s4 + $0x50] sm:$0xff]  ;;  %v1176_v53 = vunpack.c.l.bf16 %v1778_v42 }
  0xa5   :  { %v117_v61 = vpop.permute.xlu1 %116  ;;  %v112_v62 = vpop.permute.xlu0 %111  ;;  %v72_v60 = vunpack.c.h.bf16 %v1790_v49  ;;  %v71_v7 = vunpack.c.l.bf16 %v1790_v49 }
  0xa6   :  { %v186_v4 = vmul.f32 %v117_v61, %v58_v44  ;;  %v184_v5 = vmul.f32 %v112_v62, %v56_v50  ;;  %v185_v15 = vmul.f32 %v117_v61, %v57_v54  ;;  %v183_v16 = vmul.f32 %v112_v62, %v55_v55  ;;  %v776_v44 = vld [vmem:[%s2119_s8 + $0x18] sm:$0xff]  ;;  %v1801_v61 = vld [vmem:[%s2118_s4 + $0x68] sm:$0xff]  ;;  %v793_v62 = vld [vmem:[%s2119_s8 + $0xa0] sm:$0xff] }
  0xa7   :  { %1311 = vmatpush1.bf16.msra.mxu0 %v1310_v58  ;;  %1391 = vmatpush1.bf16.msra.mxu1 %v1310_v58  ;;  %v69_v50 = vunpack.c.l.bf16 %v1744_v19  ;;  %v1350_v54 = vpack.c.bf16 %v776_v44, %v775_v43  ;;  %v78_v8 = vunpack.c.h.bf16 %v1801_v61  ;;  %v777_v19 = vld [vmem:[%s2119_s8 + $0x20] sm:$0xff]  ;;  %v1195_v44 = vld [vmem:[%s2120_s3 + $0x18] sm:$0xff]  }
  0xa8   :  { %1313 = vmatprep.subr.bf16.mxu0 %v1312_v3  ;;  %1345 = vmatprep.subr.bf16.mxu1 %v1344_v2  ;;  %v1316_v24 = vpack.c.bf16 %v186_v4, %v184_v5  ;;  %v1318_v36 = vpack.c.bf16 %v185_v15, %v183_v16  ;;  %v1161_v3 = vunpack.c.h.bf16 %v1763_v30  ;;  %v1814_v4 = vld [vmem:[%s2118_s4 + $0x60] sm:$0xff]  ;;  %v73_v5 = vunpack.c.l.bf16 %v1770_v33 }
  0xa9   :  { %v127_v17 = vpop.permute.xlu1 %126  ;;  %v122_v18 = vpop.permute.xlu0 %121  ;;  %v75_v28 = vunpack.c.l.bf16 %v1814_v4 }
  0xaa   :  { %v190_v25 = vmul.f32 %v127_v17, %v62_v56  ;;  %v188_v26 = vmul.f32 %v122_v18, %v60_v57  ;;  %516 = vmatmul.mubr.f32.vlgmr.msra.gmra.mrb[0].mxu0 %v1156_v6  ;;  %564 = vmatmul.mubr.f32.vlgmr.msra.gmra.mrb[0].mxu1 %v1172_v13  ;;  %v189_v37 = vmul.f32 %v127_v17, %v61_v9  ;;  %v1821_v6 = vld [vmem:[%s2120_s3 + $0x10] sm:$0xff]   ;;  %v1828_v9 = vld [vmem:[%s2118_s4 + $0x78] sm:$0xff]  ;;  %v76_v17 = vunpack.c.h.bf16 %v1814_v4 }
  0xab   :  { %1315 = vmatpush1.bf16.msra.mxu0 %v1314_v14  ;;  %521 = vmatprep.mubr.f32.mxu0 %v1429_v23  ;;  %v187_v38 = vmul.f32 %v122_v18, %v59_v10  ;;  %v1177_v10 = vunpack.c.h.bf16 %v1778_v42  ;;  %v1836_v18 = vld [vmem:[%s2120_s3 + $0x30] sm:$0xff]   ;;  %v1165_v43 = vunpack.c.h.bf16 %v1821_v6 }
  0xac   :  { %1317 = vmatprep.subr.bf16.mxu0 %v1316_v24  ;;  %569 = vmatprep.mubr.f32.mxu1 %v1429_v23  ;;  %v1320_v45 = vpack.c.bf16 %v190_v25, %v188_v26  ;;  %v1164_v25 = vunpack.c.l.bf16 %v1821_v6  ;;  %v1848_v26 = vld [vmem:[%s2118_s4 + $0x70] sm:$0xff]  ;;  %v1180_v30 = vunpack.c.l.bf16 %v1836_v18  ;;  %v1181_v49 = vunpack.c.h.bf16 %v1836_v18  ;;  %v802_v18 = vld [vmem:[%s2119_s8 + $0xe8] sm:$0xff] }
  0xad   :  { %v137_v39 = vpop.permute.xlu1 %136  ;;  %v132_v40 = vpop.permute.xlu0 %131  ;;  %1347 = vmatpush3.bf16.msra.mxu1 %v1346_v20  ;;  %v1322_v55 = vpack.c.bf16 %v189_v37, %v187_v38  ;;  %v778_v20 = vld [vmem:[%s2119_s8 + $0x28] sm:$0xff]  ;;  %v80_v37 = vunpack.c.h.bf16 %v1848_v26  ;;  %v795_v38 = vld [vmem:[%s2119_s8 + $0xb0] sm:$0xff] }
  0xae   :  { %v194_v46 = vmul.f32 %v137_v39, %v66_v11  ;;  %v192_v47 = vmul.f32 %v132_v40, %v64_v12  ;;  %522 = vmatmul.mubr.f32.gmra.mrb[2].mxu0 %v1157_v27  ;;  %570 = vmatmul.mubr.f32.gmra.mrb[2].mxu1 %v1173_v34  ;;  %v193_v56 = vmul.f32 %v137_v39, %v65_v29  ;;  %v77_v27 = vunpack.c.l.bf16 %v1801_v61  ;;  %v796_v39 = vld [vmem:[%s2119_s8 + $0xb8] sm:$0xff] }
  0xaf   :  { %1319 = vmatpush1.bf16.msra.mxu0 %v1318_v36  ;;  %527 = vmatprep.mubr.f32.mxu0 %v1429_v23  ;;  %v191_v57 = vmul.f32 %v132_v40, %v63_v31  ;;  %v1352_v11 = vpack.c.bf16 %v794_v63, %v793_v62  ;;  %v82_v29 = vunpack.c.h.bf16 %v1828_v9  ;;  %v1354_v31 = vpack.c.bf16 %v778_v20, %v777_v19 }
  0xb0   :  { %1321 = vmatprep.subr.bf16.mxu0 %v1320_v45  ;;  %575 = vmatprep.mubr.f32.mxu1 %v1429_v23  ;;  %v1324_v0 = vpack.c.bf16 %v194_v46, %v192_v47  ;;  %v779_v45 = vld [vmem:[%s2119_s8 + $0x30] sm:$0xff]  ;;  %v780_v46 = vld [vmem:[%s2119_s8 + $0x38] sm:$0xff]  ;;  %v81_v47 = vunpack.c.l.bf16 %v1828_v9 }
  0xb1   :  { %v147_v58 = vpop.permute.xlu1 %146  ;;  %v142_v59 = vpop.permute.xlu0 %141  ;;  %1349 = vmatprep.subr.bf16.mxu1 %v1348_v35  ;;  %v1326_v12 = vpack.c.bf16 %v193_v56, %v191_v57  ;;  %v1168_v56 = vunpack.c.l.bf16 %v1195_v44  ;;  %v1199_v57 = vld [vmem:[%s2120_s3 + $0x38] sm:$0xff]   ;;  %v1358_v63 = vpack.c.bf16 %v780_v46, %v779_v45  ;;  %v1191_v46 = vld [vmem:[%s2121_s2 + $0x30] sm:$0xff]  }
  0xb2   :  { %v198_v1 = vmul.f32 %v147_v58, %v70_v32  ;;  %v196_v2 = vmul.f32 %v142_v59, %v68_v41  ;;  %528 = vmatmul.mubr.f32.gmra.mrb[4].mxu0 %v1160_v48  ;;  %576 = vmatmul.mubr.f32.gmra.mrb[4].mxu1 %v1176_v53  ;;  %v197_v13 = vmul.f32 %v147_v58, %v69_v50  ;;  %v79_v48 = vunpack.c.l.bf16 %v1848_v26  ;;  %v797_v58 = vld [vmem:[%s2119_s8 + $0xc0] sm:$0xff]  ;;  %v803_v26 = vld [vmem:[%s2119_s8 + $0xf0] sm:$0xff] }
  0xb3   :  { %1323 = vmatpush1.bf16.msra.mxu0 %v1322_v55  ;;  %533 = vmatprep.mubr.f32.mxu0 %v1429_v23  ;;  %v195_v14 = vmul.f32 %v142_v59, %v67_v51  ;;  %v1356_v50 = vpack.c.bf16 %v796_v39, %v795_v38  ;;  %v798_v59 = vld [vmem:[%s2119_s8 + $0xc8] sm:$0xff] }
  0xb4   :  { %1325 = vmatprep.subr.bf16.mxu0 %v1324_v0  ;;  %581 = vmatprep.mubr.f32.mxu1 %v1429_v23  ;;  %v1328_v21 = vpack.c.bf16 %v198_v1, %v196_v2  ;;  %v781_v0 = vld [vmem:[%s2119_s8 + $0x40] sm:$0xff]  ;;  %v782_v1 = vld [vmem:[%s2119_s8 + $0x48] sm:$0xff]  ;;  %v1184_v2 = vunpack.c.l.bf16 %v1199_v57 }
  0xb5   :  { %v157_v15 = vpop.permute.xlu1 %156  ;;  %v152_v16 = vpop.permute.xlu0 %151  ;;  %1351 = vmatpush3.bf16.msra.mxu1 %v1350_v54  ;;  %v1330_v32 = vpack.c.bf16 %v197_v13, %v195_v14  ;;  %v783_v13 = vld [vmem:[%s2119_s8 + $0x50] sm:$0xff]  ;;  %v784_v14 = vld [vmem:[%s2119_s8 + $0x58] sm:$0xff] }
  0xb6   :  { %v202_v22 = vmul.f32 %v157_v15, %v74_v52  ;;  %v200_v24 = vmul.f32 %v152_v16, %v72_v60  ;;  %534 = vmatmul.mubr.f32.gmra.mrb[6].mxu0 %v1161_v3  ;;  %582 = vmatmul.mubr.f32.gmra.mrb[6].mxu1 %v1177_v10  ;;  %v201_v33 = vmul.f32 %v157_v15, %v73_v5  ;;  %v1169_v10 = vunpack.c.h.bf16 %v1195_v44 }
  0xb7   :  { %1327 = vmatpush1.bf16.msra.mxu0 %v1326_v12  ;;  %539 = vmatprep.mubr.f32.mxu0 %v1429_v23  ;;  %v199_v34 = vmul.f32 %v152_v16, %v71_v7  ;;  %v1360_v3 = vpack.c.bf16 %v798_v59, %v797_v58  ;;  %v799_v7 = vld [vmem:[%s2119_s8 + $0xd0] sm:$0xff]  ;;  %v1123_v12 = vld [vmem:[%s2121_s2] sm:$0xff]   ;;  %v1185_v15 = vunpack.c.h.bf16 %v1199_v57 }
  0xb8   :  { %1329 = vmatprep.subr.bf16.mxu0 %v1328_v21  ;;  %587 = vmatprep.mubr.f32.mxu1 %v1429_v23  ;;  %v1332_v40 = vpack.c.bf16 %v202_v22, %v200_v24  ;;  %v1124_v20 = vunpack.c.l.bf16 %v1123_v12  ;;  %v1366_v21 = vpack.c.bf16 %v784_v14, %v783_v13  ;;  %v785_v24 = vld [vmem:[%s2119_s8 + $0x60] sm:$0xff] }
  0xb9   :  { %v167_v35 = vpop.permute.xlu1 %166  ;;  %v162_v36 = vpop.permute.xlu0 %161  ;;  %1353 = vmatprep.subr.bf16.mxu1 %v1352_v11  ;;  %v1334_v51 = vpack.c.bf16 %v201_v33, %v199_v34  ;;  %v1362_v11 = vpack.c.bf16 %v782_v1, %v781_v0  ;;  %v1187_v34 = vld [vmem:[%s2121_s2 + $0x10] sm:$0xff]  }
  0xba   :  { %v206_v41 = vmul.f32 %v167_v35, %v78_v8  ;;  %v204_v42 = vmul.f32 %v162_v36, %v76_v17  ;;  %540 = vmatmul.mubr.f32.gmra.mrb[8].mxu0 %v1164_v25  ;;  %588 = vmatmul.mubr.f32.gmra.mrb[8].mxu1 %v1180_v30  ;;  %v205_v52 = vmul.f32 %v167_v35, %v77_v27  ;;  %v800_v8 = vld [vmem:[%s2119_s8 + $0xd8] sm:$0xff]  ;;  %v801_v17 = vld [vmem:[%s2119_s8 + $0xe0] sm:$0xff]  ;;  %v786_v25 = vld [vmem:[%s2119_s8 + $0x68] sm:$0xff]  ;;  %v1132_v35 = vunpack.c.l.bf16 %v1187_v34 }
  0xbb   :  { %1331 = vmatpush1.bf16.msra.mxu0 %v1330_v32  ;;  %545 = vmatprep.mubr.f32.mxu0 %v1429_v23  ;;  %v203_v53 = vmul.f32 %v162_v36, %v75_v28  ;;  %v1364_v16 = vpack.c.bf16 %v800_v8, %v799_v7  ;;  %v1368_v22 = vpack.c.bf16 %v802_v18, %v801_v17  ;;  %v804_v27 = vld [vmem:[%s2119_s8 + $0xf8] sm:$0xff]  ;;  %v1125_v28 = vunpack.c.h.bf16 %v1123_v12  ;;  %v1186_v30 = vld [vmem:[%s2121_s2 + $0x8] sm:$0xff]  }
  0xbc   :  { %1333 = vmatprep.subr.bf16.mxu0 %v1332_v40  ;;  %593 = vmatprep.mubr.f32.mxu1 %v1429_v23  ;;  %v1336_v60 = vpack.c.bf16 %v206_v41, %v204_v42  ;;  %v1128_v32 = vunpack.c.l.bf16 %v1186_v30  ;;  %v1129_v33 = vunpack.c.h.bf16 %v1186_v30  ;;  %v1133_v36 = vunpack.c.h.bf16 %v1187_v34  ;;  %v1189_v40 = vld [vmem:[%s2121_s2 + $0x20] sm:$0xff]  }
  0xbd   :  { %v177_v54 = vpop.permute.xlu1 %176  ;;  %v172_v55 = vpop.permute.xlu0 %171  ;;  %1355 = vmatpush3.bf16.msra.mxu1 %v1354_v31  ;;  %v1338_v4 = vpack.c.bf16 %v205_v52, %v203_v53  ;;  %v1372_v31 = vpack.c.bf16 %v804_v27, %v803_v26  ;;  %v1140_v41 = vunpack.c.l.bf16 %v1189_v40  ;;  %v1141_v42 = vunpack.c.h.bf16 %v1189_v40  ;;  %v787_v52 = vld [vmem:[%s2119_s8 + $0x70] sm:$0xff]  ;;  %v788_v53 = vld [vmem:[%s2119_s8 + $0x78] sm:$0xff] }
  0xbe   :  { %v210_v61 = vmul.f32 %v177_v54, %v82_v29  ;;  %v208_v62 = vmul.f32 %v172_v55, %v80_v37  ;;  %546 = vmatmul.mubr.f32.gmra.mrb[10].mxu0 %v1165_v43  ;;  %594 = vmatmul.mubr.f32.gmra.mrb[10].mxu1 %v1181_v49  ;;  %v209_v5 = vmul.f32 %v177_v54, %v81_v47  ;;  %v1188_v37 = vld [vmem:[%s2121_s2 + $0x18] sm:$0xff]   ;;  %v1190_v43 = vld [vmem:[%s2121_s2 + $0x28] sm:$0xff]   ;;  %v1148_v47 = vunpack.c.l.bf16 %v1191_v46 }
  0xbf   :  { %1335 = vmatpush1.bf16.msra.mxu0 %v1334_v51  ;;  %551 = vmatprep.mubr.f32.mxu0 %v1429_v23  ;;  %v207_v6 = vmul.f32 %v172_v55, %v79_v48  ;;  %v1370_v29 = vpack.c.bf16 %v786_v25, %v785_v24  ;;  %v1136_v38 = vunpack.c.l.bf16 %v1188_v37  ;;  %v1137_v39 = vunpack.c.h.bf16 %v1188_v37  ;;  %v1192_v49 = vld [vmem:[%s2121_s2 + $0x38] sm:$0xff]  }
  0xc0   :  { %1337 = vmatprep.subr.bf16.mxu0 %v1336_v60  ;;  %599 = vmatprep.mubr.f32.mxu1 %v1429_v23  ;;  %v1340_v9 = vpack.c.bf16 %v210_v61, %v208_v62  ;;  %v1144_v44 = vunpack.c.l.bf16 %v1190_v43  ;;  %v1145_v45 = vunpack.c.h.bf16 %v1190_v43  ;;  %v1149_v48 = vunpack.c.h.bf16 %v1191_v46 }
  0xc1   :  { %1357 = vmatprep.subr.bf16.mxu1 %v1356_v50  ;;  %v1342_v19 = vpack.c.bf16 %v209_v5, %v207_v6  ;;  %v1152_v50 = vunpack.c.l.bf16 %v1192_v49  ;;  %v1153_v51 = vunpack.c.h.bf16 %v1192_v49  ;;  %v1374_v54 = vpack.c.bf16 %v788_v53, %v787_v52 }
  0xc2   :  { %552 = vmatmul.mubr.f32.gmra.mrb[12].mxu0 %v1168_v56  ;;  %1359 = vmatpush3.bf16.msra.mxu1 %v1358_v63 }
  0xc3   :  { %1339 = vmatpush1.bf16.msra.mxu0 %v1338_v4  ;;  %557 = vmatprep.mubr.f32.mxu0 %v1429_v23 }
  0xc4   :  { %1341 = vmatprep.subr.bf16.mxu0 %v1340_v9  ;;  %600 = vmatmul.mubr.f32.gmra.mrb[12].mxu1 %v1184_v2 }
  0xc5   :  { %605 = vmatprep.mubr.f32.mxu1 %v1429_v23  ;;  %1361 = vmatprep.subr.bf16.mxu1 %v1360_v3 }
  0xc6   :  { %558 = vmatmul.mubr.f32.gmra.mrb[14].mxu0 %v1169_v10  ;;  %1363 = vmatpush3.bf16.msra.mxu1 %v1362_v11 }
  0xc7   :  { %1343 = vmatpush1.bf16.msra.mxu0 %v1342_v19  ;;  %676 = vmatprep.mubr.f32.mxu0 %v1429_v23 }
  0xc8   :  { %606 = vmatmul.mubr.f32.gmra.mrb[14].mxu1 %v1185_v15  ;;  %1365 = vmatprep.subr.bf16.mxu1 %v1364_v16 }
  0xca   :  { %677 = vmatmul.mubr.f32.vlgmr.msra.gmra.mrb[0].mxu0 %v1124_v20  ;;  %1367 = vmatpush3.bf16.msra.mxu1 %v1366_v21 }
  0xcb   :  { %682 = vmatprep.mubr.f32.mxu0 %v1429_v23  ;;  %1369 = vmatprep.subr.bf16.mxu1 %v1368_v22 }
  0xce   :  { %683 = vmatmul.mubr.f32.gmra.mrb[2].mxu0 %v1125_v28  ;;  %1371 = vmatpush3.bf16.msra.mxu1 %v1370_v29 }
  0xcf   :  { %688 = vmatprep.mubr.f32.mxu0 %v1429_v23  ;;  %1373 = vmatprep.subr.bf16.mxu1 %v1372_v31 }
  0xd2   :  { %689 = vmatmul.mubr.f32.gmra.mrb[4].mxu0 %v1128_v32  ;;  %1375 = vmatpush3.bf16.msra.mxu1 %v1374_v54 }
  0xd3   :  { %694 = vmatprep.mubr.f32.mxu0 %v1429_v23 }
  0xd6   :  { %695 = vmatmul.mubr.f32.gmra.mrb[6].mxu0 %v1129_v33 }
  0xd7   :  { %700 = vmatprep.mubr.f32.mxu0 %v1429_v23 }
  0xda   :  { %701 = vmatmul.mubr.f32.gmra.mrb[8].mxu0 %v1132_v35 }
  0xdb   :  { %706 = vmatprep.mubr.f32.mxu0 %v1429_v23 }
  0xde   :  { %707 = vmatmul.mubr.f32.gmra.mrb[10].mxu0 %v1133_v36 }
  0xdf   :  { %712 = vmatprep.mubr.f32.mxu0 %v1429_v23 }
  0xe2   :  { %713 = vmatmul.mubr.f32.gmra.mrb[12].mxu0 %v1136_v38 }
  0xe3   :  { %718 = vmatprep.mubr.f32.mxu0 %v1429_v23 }
  0xe6   :  { %719 = vmatmul.mubr.f32.gmra.mrb[14].mxu0 %v1137_v39 }
  0xe7   :  { %724 = vmatprep.mubr.f32.mxu0 %v1429_v23 }
  0xea   :  { %725 = vmatmul.mubr.f32.gmra.mrb[16].mxu0 %v1140_v41 }
  0xeb   :  { %730 = vmatprep.mubr.f32.mxu0 %v1429_v23 }
  0xee   :  { %731 = vmatmul.mubr.f32.gmra.mrb[18].mxu0 %v1141_v42 }
  0xef   :  { %736 = vmatprep.mubr.f32.mxu0 %v1429_v23 }
  0xf2   :  { %737 = vmatmul.mubr.f32.gmra.mrb[20].mxu0 %v1144_v44 }
  0xf3   :  { %742 = vmatprep.mubr.f32.mxu0 %v1429_v23 }
  0xf6   :  { %743 = vmatmul.mubr.f32.gmra.mrb[22].mxu0 %v1145_v45 }
  0xf7   :  { %748 = vmatprep.mubr.f32.mxu0 %v1429_v23 }
  0xfa   :  { %749 = vmatmul.mubr.f32.gmra.mrb[24].mxu0 %v1148_v47 }
  0xfb   :  { %754 = vmatprep.mubr.f32.mxu0 %v1429_v23 }
  0xfe   :  { %755 = vmatmul.mubr.f32.gmra.mrb[26].mxu0 %v1149_v48 }
  0xff   :  { %760 = vmatprep.mubr.f32.mxu0 %v1429_v23 }
 0x102   :  { %761 = vmatmul.mubr.f32.gmra.mrb[28].mxu0 %v1152_v50 }
 0x103   :  { %766 = vmatprep.mubr.f32.mxu0 %v1429_v23 }
 0x106   :  { %767 = vmatmul.mubr.f32.gmra.mrb[30].mxu0 %v1153_v51 }
 0x17d   :  { %v565_v55 = vpop.f32.mrb[0].mxu1 }
 0x17e   :  { %v567_v56 = vpop.f32.mrb[1].mxu1 }
 0x181   :  { %v571_v57 = vpop.f32.mrb[2].mxu1 }
 0x182   :  { %v573_v58 = vpop.f32.mrb[3].mxu1 }
 0x185   :  { %v577_v59 = vpop.f32.mrb[4].mxu1 }
 0x186   :  { %v579_v60 = vpop.f32.mrb[5].mxu1 }
 0x189   :  { %v583_v61 = vpop.f32.mrb[6].mxu1 }
 0x18a   :  { %v585_v62 = vpop.f32.mrb[7].mxu1 }
 0x18d   :  { %v1973_v23 = vpop.f32.mrb[8].mxu1 }
 0x18e   :  { %v1975_v63 = vpop.f32.mrb[9].mxu1 }
 0x191   :  { %v1977_v0 = vpop.f32.mrb[10].mxu1 }
 0x192   :  { %v1979_v1 = vpop.f32.mrb[11].mxu1 }
 0x197   :  { %v1981_v2 = vpop.f32.mrb[12].mxu1 }
 0x198   :  { %v1983_v3 = vpop.f32.mrb[13].mxu1 }
 0x19b   :  { %v1985_v4 = vpop.f32.mrb[14].mxu1 }
 0x19c   :  { %v1987_v5 = vpop.f32.mrb[15].mxu1 }
 0x19d   :  { %v678_v6 = vpop.f32.mrb[0].mxu0 }
 0x19e   :  { %v680_v7 = vpop.f32.mrb[1].mxu0 }
 0x19f   :  { %876 = vmatprep.mubr.f32.mxu1 %v680_v7 }
 0x1a0   :  { %877 = vmatmul.mubr.f32.vlgmr.msra.gmra.mrb[16].mxu1 %v678_v6 }
 0x1a1   :  { %v684_v8 = vpop.f32.mrb[2].mxu0 }
 0x1a2   :  { %v686_v9 = vpop.f32.mrb[3].mxu0 }
 0x1a3   :  { %881 = vmatprep.mubr.f32.mxu1 %v686_v9 }
 0x1a4   :  { %882 = vmatmul.mubr.f32.gmra.mrb[18].mxu1 %v684_v8 }
 0x1a5   :  { %v690_v10 = vpop.f32.mrb[4].mxu0 }
 0x1a6   :  { %v692_v11 = vpop.f32.mrb[5].mxu0 }
 0x1a7   :  { %886 = vmatprep.mubr.f32.mxu1 %v692_v11 }
 0x1a8   :  { %887 = vmatmul.mubr.f32.gmra.mrb[20].mxu1 %v690_v10 }
 0x1a9   :  { %v696_v12 = vpop.f32.mrb[6].mxu0 }
 0x1aa   :  { %v698_v13 = vpop.f32.mrb[7].mxu0 }
 0x1ab   :  { %891 = vmatprep.mubr.f32.mxu1 %v698_v13  ;;  %v959_v13 = vld [vmem:[%s2123_s0 + $0x10] sm:$0xff] }
 0x1ac   :  { %892 = vmatmul.mubr.f32.gmra.mrb[22].mxu1 %v696_v12 }
 0x1ad   :  { %v702_v14 = vpop.f32.mrb[8].mxu0 }
 0x1ae   :  { %v704_v15 = vpop.f32.mrb[9].mxu0 }
 0x1af   :  { %896 = vmatprep.mubr.f32.mxu1 %v704_v15 }
 0x1b0   :  { %897 = vmatmul.mubr.f32.gmra.mrb[24].mxu1 %v702_v14 }
 0x1b1   :  { %v708_v16 = vpop.f32.mrb[10].mxu0 }
 0x1b2   :  { %v710_v17 = vpop.f32.mrb[11].mxu0 }
 0x1b3   :  { %901 = vmatprep.mubr.f32.mxu1 %v710_v17 }
 0x1b4   :  { %902 = vmatmul.mubr.f32.gmra.mrb[26].mxu1 %v708_v16 }
 0x1b5   :  { %v714_v18 = vpop.f32.mrb[12].mxu0 }
 0x1b6   :  { %v716_v19 = vpop.f32.mrb[13].mxu0 }
 0x1b7   :  { %906 = vmatprep.mubr.f32.mxu1 %v716_v19 }
 0x1b8   :  { %907 = vmatmul.mubr.f32.gmra.mrb[28].mxu1 %v714_v18 }
 0x1b9   :  { %v720_v20 = vpop.f32.mrb[14].mxu0 }
 0x1ba   :  { %v722_v21 = vpop.f32.mrb[15].mxu0 }
 0x1bb   :  { %911 = vmatprep.mubr.f32.mxu1 %v722_v21  ;;  %v960_v21 = vld [vmem:[%s2123_s0 + $0x18] sm:$0xff] }
 0x1bc   :  { %912 = vmatmul.mubr.f32.gmra.mrb[30].mxu1 %v720_v20 }
 0x1bd   :  { %v726_v22 = vpop.f32.mrb[16].mxu0 }
 0x1be   :  { %v727_v24 = vadd.f32 %v726_v22, %v565_v55  ;;  %v728_v25 = vpop.f32.mrb[17].mxu0 }
 0x1bf   :  { %v729_v26 = vadd.f32 %v728_v25, %v567_v56  ;;  %v2000_v56 = vld [vmem:[%s2122_s9] ss:$0 sm:$0xff] }
 0x1c1   :  { %v732_v27 = vpop.f32.mrb[18].mxu0  ;;  %916 = vmatprep.mubr.f32.mxu1 %v729_v26 }
 0x1c2   :  { %v733_v28 = vadd.f32 %v732_v27, %v571_v57  ;;  %v734_v29 = vpop.f32.mrb[19].mxu0  ;;  %917 = vmatmul.mubr.f32.gmra.mrb[32].mxu1 %v727_v24 }
 0x1c3   :  { %v735_v30 = vadd.f32 %v734_v29, %v573_v58 }
 0x1c5   :  { %v738_v31 = vpop.f32.mrb[20].mxu0  ;;  %921 = vmatprep.mubr.f32.mxu1 %v735_v30  ;;  %v961_v30 = vld [vmem:[%s2123_s0 + $0x20] sm:$0xff] }
 0x1c6   :  { %v739_v32 = vadd.f32 %v738_v31, %v577_v59  ;;  %v740_v33 = vpop.f32.mrb[21].mxu0  ;;  %922 = vmatmul.mubr.f32.gmra.mrb[34].mxu1 %v733_v28 }
 0x1c7   :  { %v741_v34 = vadd.f32 %v740_v33, %v579_v60 }
 0x1c9   :  { %v744_v35 = vpop.f32.mrb[22].mxu0  ;;  %926 = vmatprep.mubr.f32.mxu1 %v741_v34 }
 0x1ca   :  { %v745_v36 = vadd.f32 %v744_v35, %v583_v61  ;;  %v746_v37 = vpop.f32.mrb[23].mxu0  ;;  %927 = vmatmul.mubr.f32.gmra.mrb[36].mxu1 %v739_v32  ;;  %v992_v61 = vpop.permute.xlu0 %991 }
 0x1cb   :  { %v747_v38 = vadd.f32 %v746_v37, %v585_v62  ;;  %v957_v62 = vld [vmem:[%s2123_s0] sm:$0xff] }
 0x1cd   :  { %v750_v39 = vpop.f32.mrb[24].mxu0  ;;  %931 = vmatprep.mubr.f32.mxu1 %v747_v38  ;;  %v962_v38 = vld [vmem:[%s2123_s0 + $0x28] sm:$0xff] }
 0x1ce   :  { %v751_v40 = vadd.f32 %v750_v39, %v1973_v23  ;;  %v752_v41 = vpop.f32.mrb[25].mxu0  ;;  %932 = vmatmul.mubr.f32.gmra.mrb[38].mxu1 %v745_v36  ;;  %v1002_v12 = vpop.permute.xlu0 %1001 }
 0x1cf   :  { %v753_v42 = vadd.f32 %v752_v41, %v1975_v63 }
 0x1d1   :  { %v756_v43 = vpop.f32.mrb[26].mxu0  ;;  %936 = vmatprep.mubr.f32.mxu1 %v753_v42 }
 0x1d2   :  { %v757_v44 = vadd.f32 %v756_v43, %v1977_v0  ;;  %v758_v45 = vpop.f32.mrb[27].mxu0  ;;  %937 = vmatmul.mubr.f32.gmra.mrb[40].mxu1 %v751_v40  ;;  %v1012_v29 = vpop.permute.xlu0 %1011 }
 0x1d3   :  { %v759_v46 = vadd.f32 %v758_v45, %v1979_v1 }
 0x1d5   :  { %v762_v47 = vpop.f32.mrb[28].mxu0  ;;  %941 = vmatprep.mubr.f32.mxu1 %v759_v46  ;;  %v963_v46 = vld [vmem:[%s2123_s0 + $0x30] sm:$0xff] }
 0x1d6   :  { %v763_v48 = vadd.f32 %v762_v47, %v1981_v2  ;;  %v764_v49 = vpop.f32.mrb[29].mxu0  ;;  %942 = vmatmul.mubr.f32.gmra.mrb[42].mxu1 %v757_v44  ;;  %v1022_v45 = vpop.permute.xlu0 %1021 }
 0x1d7   :  { %v765_v50 = vadd.f32 %v764_v49, %v1983_v3 }
 0x1d9   :  { %v768_v51 = vpop.f32.mrb[30].mxu0  ;;  %946 = vmatprep.mubr.f32.mxu1 %v765_v50 }
 0x1da   :  { %v769_v52 = vadd.f32 %v768_v51, %v1985_v4  ;;  %v770_v53 = vpop.f32.mrb[31].mxu0  ;;  %947 = vmatmul.mubr.f32.gmra.mrb[44].mxu1 %v763_v48  ;;  %v997_v4 = vpop.permute.xlu1 %996 }
 0x1db   :  { %v771_v54 = vadd.f32 %v770_v53, %v1987_v5  ;;  %v958_v5 = vld [vmem:[%s2123_s0 + $0x8] sm:$0xff]  ;;  %v964_v53 = vld [vmem:[%s2123_s0 + $0x38] sm:$0xff] }
 0x1dd   :  { %951 = vmatprep.mubr.f32.mxu1 %v771_v54 }
 0x1de   :  { %952 = vmatmul.mubr.f32.gmra.mrb[46].mxu1 %v769_v52  ;;  %v1007_v20 = vpop.permute.xlu1 %1006 }
 0x1e2   :  { %v1017_v37 = vpop.permute.xlu1 %1016 }
 0x1e6   :  { %v1027_v52 = vpop.permute.xlu1 %1026 }
 0x273   :  { %v1232_v55 = vpop.f32.mrb[16].mxu1 }
 0x274   :  { %v1233_v57 = vpop.f32.mrb[17].mxu1 }
 0x275   :  { %v1234_v58 = vadd.f32 %v1233_v57, %v1232_v55 }
 0x277   :  { %v879_v59 = vadd.f32 %v1234_v58, %v2000_v56  ;;  %v1235_v60 = vpop.f32.mrb[18].mxu1 }
 0x278   :  { %v1236_v23 = vpop.f32.mrb[19].mxu1 }
 0x279   :  { %v1069_v63 = vmul.f32 %v992_v61, %v879_v59  ;;  %v1237_v0 = vadd.f32 %v1236_v23, %v1235_v60  ;;  %v965_v23 = vld [vmem:[%s2123_s0 + $0x40] sm:$0xff] }
 0x27b   :  { %v1085_v1 = vadd.f32 %v1069_v63, %v957_v62  ;;  %v884_v2 = vadd.f32 %v1237_v0, %v2000_v56  ;;  %v1238_v3 = vpop.f32.mrb[20].mxu1  ;;  %v1032_v62 = vpop.permute.xlu0 %1031 }
 0x27c   :  { %v1239_v6 = vpop.f32.mrb[21].mxu1 }
 0x27d   :  { %1101 = vst [vmem:[%s2124_s10] sm:$0xff] %v1085_v1  ;;  %v1070_v7 = vmul.f32 %v997_v4, %v884_v2  ;;  %v1240_v8 = vadd.f32 %v1239_v6, %v1238_v3  ;;  %v966_v6 = vld [vmem:[%s2123_s0 + $0x48] sm:$0xff] }
 0x27f   :  { %v1086_v9 = vadd.f32 %v1070_v7, %v958_v5  ;;  %v889_v10 = vadd.f32 %v1240_v8, %v2000_v56  ;;  %v1241_v11 = vpop.f32.mrb[22].mxu1  ;;  %v1037_v5 = vpop.permute.xlu1 %1036 }
 0x280   :  { %v1242_v14 = vpop.f32.mrb[23].mxu1 }
 0x281   :  { %1102 = vst [vmem:[%s2124_s10 + $0x8] sm:$0xff] %v1086_v9  ;;  %v1071_v15 = vmul.f32 %v1002_v12, %v889_v10  ;;  %v1243_v16 = vadd.f32 %v1242_v14, %v1241_v11  ;;  %v967_v14 = vld [vmem:[%s2123_s0 + $0x50] sm:$0xff] }
 0x283   :  { %v1087_v17 = vadd.f32 %v1071_v15, %v959_v13  ;;  %v894_v18 = vadd.f32 %v1243_v16, %v2000_v56  ;;  %v1244_v19 = vpop.f32.mrb[24].mxu1  ;;  %v1042_v13 = vpop.permute.xlu0 %1041 }
 0x284   :  { %v1245_v22 = vpop.f32.mrb[25].mxu1 }
 0x285   :  { %1103 = vst [vmem:[%s2124_s10 + $0x10] sm:$0xff] %v1087_v17  ;;  %v1072_v24 = vmul.f32 %v1007_v20, %v894_v18  ;;  %v1246_v25 = vadd.f32 %v1245_v22, %v1244_v19  ;;  %v968_v22 = vld [vmem:[%s2123_s0 + $0x58] sm:$0xff] }
 0x287   :  { %v1088_v26 = vadd.f32 %v1072_v24, %v960_v21  ;;  %v899_v27 = vadd.f32 %v1246_v25, %v2000_v56  ;;  %v1247_v28 = vpop.f32.mrb[26].mxu1  ;;  %v1047_v21 = vpop.permute.xlu1 %1046 }
 0x288   :  { %v1248_v31 = vpop.f32.mrb[27].mxu1 }
 0x289   :  { %1104 = vst [vmem:[%s2124_s10 + $0x18] sm:$0xff] %v1088_v26  ;;  %v1073_v32 = vmul.f32 %v1012_v29, %v899_v27  ;;  %v1249_v33 = vadd.f32 %v1248_v31, %v1247_v28  ;;  %v969_v31 = vld [vmem:[%s2123_s0 + $0x60] sm:$0xff] }
 0x28b   :  { %v1089_v34 = vadd.f32 %v1073_v32, %v961_v30  ;;  %v904_v35 = vadd.f32 %v1249_v33, %v2000_v56  ;;  %v1250_v36 = vpop.f32.mrb[28].mxu1  ;;  %v1052_v30 = vpop.permute.xlu0 %1051 }
 0x28c   :  { %v1251_v39 = vpop.f32.mrb[29].mxu1 }
 0x28d   :  { %1105 = vst [vmem:[%s2124_s10 + $0x20] sm:$0xff] %v1089_v34  ;;  %v1074_v40 = vmul.f32 %v1017_v37, %v904_v35  ;;  %v1252_v41 = vadd.f32 %v1251_v39, %v1250_v36  ;;  %v970_v39 = vld [vmem:[%s2123_s0 + $0x68] sm:$0xff] }
 0x28f   :  { %v1090_v42 = vadd.f32 %v1074_v40, %v962_v38  ;;  %v909_v43 = vadd.f32 %v1252_v41, %v2000_v56  ;;  %v1253_v44 = vpop.f32.mrb[30].mxu1  ;;  %v1057_v38 = vpop.permute.xlu1 %1056 }
 0x290   :  { %v1254_v47 = vpop.f32.mrb[31].mxu1 }
 0x291   :  { %1106 = vst [vmem:[%s2124_s10 + $0x28] sm:$0xff] %v1090_v42  ;;  %v1075_v48 = vmul.f32 %v1022_v45, %v909_v43  ;;  %v1255_v49 = vadd.f32 %v1254_v47, %v1253_v44  ;;  %v971_v47 = vld [vmem:[%s2123_s0 + $0x70] sm:$0xff] }
 0x293   :  { %v1091_v50 = vadd.f32 %v1075_v48, %v963_v46  ;;  %v914_v51 = vadd.f32 %v1255_v49, %v2000_v56  ;;  %v1062_v46 = vpop.permute.xlu0 %1061 }
 0x295   :  { %1107 = vst [vmem:[%s2124_s10 + $0x30] sm:$0xff] %v1091_v50  ;;  %v1076_v54 = vmul.f32 %v1027_v52, %v914_v51  ;;  %v1256_v55 = vpop.f32.mrb[32].mxu1 }
 0x296   :  { %v1257_v57 = vpop.f32.mrb[33].mxu1 }
 0x297   :  { %v1092_v58 = vadd.f32 %v1076_v54, %v964_v53  ;;  %v1258_v59 = vadd.f32 %v1257_v57, %v1256_v55  ;;  %v1067_v53 = vpop.permute.xlu1 %1066  ;;  %v972_v54 = vld [vmem:[%s2123_s0 + $0x78] sm:$0xff] }
 0x299   :  { %1108 = vst [vmem:[%s2124_s10 + $0x38] sm:$0xff] %v1092_v58  ;;  %v919_v60 = vadd.f32 %v1258_v59, %v2000_v56  ;;  %v1259_v61 = vpop.f32.mrb[34].mxu1 }
 0x29a   :  { %v1260_v63 = vpop.f32.mrb[35].mxu1 }
 0x29b   :  { %v1077_v0 = vmul.f32 %v1032_v62, %v919_v60  ;;  %v1261_v1 = vadd.f32 %v1260_v63, %v1259_v61 }
 0x29d   :  { %v1093_v2 = vadd.f32 %v1077_v0, %v965_v23  ;;  %v924_v3 = vadd.f32 %v1261_v1, %v2000_v56  ;;  %v1262_v4 = vpop.f32.mrb[36].mxu1 }
 0x29e   :  { %v1263_v7 = vpop.f32.mrb[37].mxu1 }
 0x29f   :  { %1109 = vst [vmem:[%s2124_s10 + $0x40] sm:$0xff] %v1093_v2  ;;  %v1078_v8 = vmul.f32 %v1037_v5, %v924_v3  ;;  %v1264_v9 = vadd.f32 %v1263_v7, %v1262_v4 }
 0x2a1   :  { %v1094_v10 = vadd.f32 %v1078_v8, %v966_v6  ;;  %v929_v11 = vadd.f32 %v1264_v9, %v2000_v56  ;;  %v1265_v12 = vpop.f32.mrb[38].mxu1 }
 0x2a2   :  { %v1266_v15 = vpop.f32.mrb[39].mxu1 }
 0x2a3   :  { %1110 = vst [vmem:[%s2124_s10 + $0x48] sm:$0xff] %v1094_v10  ;;  %v1079_v16 = vmul.f32 %v1042_v13, %v929_v11  ;;  %v1267_v17 = vadd.f32 %v1266_v15, %v1265_v12 }
 0x2a5   :  { %v1095_v18 = vadd.f32 %v1079_v16, %v967_v14  ;;  %v934_v19 = vadd.f32 %v1267_v17, %v2000_v56  ;;  %v1268_v20 = vpop.f32.mrb[40].mxu1 }
 0x2a6   :  { %v1269_v24 = vpop.f32.mrb[41].mxu1 }
 0x2a7   :  { %1111 = vst [vmem:[%s2124_s10 + $0x50] sm:$0xff] %v1095_v18  ;;  %v1080_v25 = vmul.f32 %v1047_v21, %v934_v19  ;;  %v1270_v26 = vadd.f32 %v1269_v24, %v1268_v20 }
 0x2a9   :  { %v1096_v27 = vadd.f32 %v1080_v25, %v968_v22  ;;  %v939_v28 = vadd.f32 %v1270_v26, %v2000_v56  ;;  %v1271_v29 = vpop.f32.mrb[42].mxu1 }
 0x2aa   :  { %v1272_v32 = vpop.f32.mrb[43].mxu1 }
 0x2ab   :  { %1112 = vst [vmem:[%s2124_s10 + $0x58] sm:$0xff] %v1096_v27  ;;  %v1081_v33 = vmul.f32 %v1052_v30, %v939_v28  ;;  %v1273_v34 = vadd.f32 %v1272_v32, %v1271_v29 }
 0x2ad   :  { %v1097_v35 = vadd.f32 %v1081_v33, %v969_v31  ;;  %v944_v36 = vadd.f32 %v1273_v34, %v2000_v56  ;;  %v1274_v37 = vpop.f32.mrb[44].mxu1 }
 0x2ae   :  { %v1275_v40 = vpop.f32.mrb[45].mxu1 }
 0x2af   :  { %1113 = vst [vmem:[%s2124_s10 + $0x60] sm:$0xff] %v1097_v35  ;;  %v1082_v41 = vmul.f32 %v1057_v38, %v944_v36  ;;  %v1276_v42 = vadd.f32 %v1275_v40, %v1274_v37 }
 0x2b1   :  { %v1098_v43 = vadd.f32 %v1082_v41, %v970_v39  ;;  %v949_v44 = vadd.f32 %v1276_v42, %v2000_v56  ;;  %v1277_v45 = vpop.f32.mrb[46].mxu1 }
 0x2b2   :  { %v1278_v48 = vpop.f32.mrb[47].mxu1 }
 0x2b3   :  { %1114 = vst [vmem:[%s2124_s10 + $0x68] sm:$0xff] %v1098_v43  ;;  %v1083_v49 = vmul.f32 %v1062_v46, %v949_v44  ;;  %v1279_v50 = vadd.f32 %v1278_v48, %v1277_v45 }
 0x2b5   :  { %v1099_v51 = vadd.f32 %v1083_v49, %v971_v47  ;;  %v954_v52 = vadd.f32 %v1279_v50, %v2000_v56 }
 0x2b7   :  { %1115 = vst [vmem:[%s2124_s10 + $0x70] sm:$0xff] %v1099_v51  ;;  %v1084_v55 = vmul.f32 %v1067_v53, %v954_v52 }
 0x2b9   :  { %v1100_v57 = vadd.f32 %v1084_v55, %v972_v54 }
 0x2bb   :  { %1116 = vst [vmem:[%s2124_s10 + $0x78] sm:$0xff] %v1100_v57 }

</bundles_post_ra>
